<compile_context>
chip_gen: v6e
topology: v6e:2x2x1
jax: 0.10.0
libtpu: 0.0.40
codegen_flags: <defaults>
</compile_context>

<pallas_src>
import functools

import jax
import jax.numpy as jnp
import numpy as np
from jax import lax
from jax.experimental import pallas as pl
from jax.experimental.pallas import tpu as pltpu


def _bigru_rec_kernel(lens_ref, gi_f_ref, gi_b_ref, whh_ref, bhh_ref,
                      out_f_ref, out_b_ref, h_ref,
                      *, hidden_size, chunk, t_total):
    """Recurrent part of a bidirectional GRU over one time chunk.

    Block shapes (all VMEM, time-major inside the kernel):
      lens_ref : (B, 1)      int32   sequence lengths
      gi_f_ref : (C, B, 3H)  f32     precomputed x@W_ih_f + b_ih_f, chunk k
      gi_b_ref : (C, B, 3H)  f32     precomputed x@W_ih_b + b_ih_b, chunk K-1-k
      whh_ref  : (2H, 6H)    f32     block-diagonal [W_hh_f^T, 0; 0, W_hh_b^T]
      bhh_ref  : (1, 6H)     f32     [b_hh_f | b_hh_b]
      out_f_ref: (C, B, H)   f32     forward outputs for chunk k
      out_b_ref: (C, B, H)   f32     backward outputs for chunk K-1-k
      h_ref    : (B, 2H)     f32     resident carry / final hiddens [h_f | h_b]
    """
    H = hidden_size
    C = chunk
    k = pl.program_id(0)

    @pl.when(k == 0)
    def _():
        h_ref[...] = jnp.zeros_like(h_ref)

    lens = lens_ref[...]            # (B, 1) int32
    whh = whh_ref[...]              # (2H, 6H), loaded once per chunk
    bhh = bhh_ref[...]              # (1, 6H)

    def cell(gi, gh_half, h_half):
        r = jax.nn.sigmoid(gi[:, 0:H] + gh_half[:, 0:H])
        z = jax.nn.sigmoid(gi[:, H:2 * H] + gh_half[:, H:2 * H])
        n = jnp.tanh(gi[:, 2 * H:3 * H] + r * gh_half[:, 2 * H:3 * H])
        return (1.0 - z) * n + z * h_half

    def step(i, h):
        # forward processes t_f = k*C + i; backward processes t_b = T-1 - t_f
        t_f = k * C + i
        t_b = t_total - 1 - t_f

        gi_f = gi_f_ref[i]                 # (B, 3H)
        gi_b = gi_b_ref[C - 1 - i]         # (B, 3H)

        # fused hidden projection for both directions: (B,2H) x (2H,6H)
        gh = jnp.dot(h, whh, preferred_element_type=jnp.float32) + bhh

        h_f = h[:, :H]
        h_b = h[:, H:]
        hn_f = cell(gi_f, gh[:, 0:3 * H], h_f)
        hn_b = cell(gi_b, gh[:, 3 * H:6 * H], h_b)

        m_f = t_f < lens                   # (B, 1) bool
        m_b = t_b < lens

        # packed-sequence semantics: padded steps emit zeros, hidden is frozen
        out_f_ref[i] = jnp.where(m_f, hn_f, 0.0)
        out_b_ref[C - 1 - i] = jnp.where(m_b, hn_b, 0.0)

        return jnp.concatenate(
            [jnp.where(m_f, hn_f, h_f), jnp.where(m_b, hn_b, h_b)], axis=1)

    h_ref[...] = lax.fori_loop(0, C, step, h_ref[...], unroll=(C <= 16))


def recurrent_context_forward(batch, batch_length, params, *, chunk=32):
    """batch: (B, T, I) float32, batch_first. batch_length: host ints, sorted
    descending (pack_padded_sequence's enforce_sorted contract).
    Returns (outputs_unpacked (B, T_max, 2H), hidden (2, B, H))."""
    batch = jnp.asarray(batch, jnp.float32)
    lengths_np = np.asarray(batch_length, np.int32)
    B, T, I = batch.shape
    H = params["w_hh_f"].shape[1]

    C = int(min(chunk, T))
    K = pl.cdiv(T, C)
    T_pad = K * C

    # ---- input projection hoisted out of the recurrence (one big matmul) ----
    x_tm = jnp.transpose(batch, (1, 0, 2))                  # (T, B, I)
    if T_pad > T:
        x_tm = jnp.pad(x_tm, ((0, T_pad - T), (0, 0), (0, 0)))
    wih_f = jnp.asarray(params["w_ih_f"], jnp.float32).T    # (I, 3H)
    wih_b = jnp.asarray(params["w_ih_b"], jnp.float32).T
    bih_f = jnp.asarray(params["b_ih_f"], jnp.float32)
    bih_b = jnp.asarray(params["b_ih_b"], jnp.float32)
    gi_f = jnp.einsum("tbi,ig->tbg", x_tm, wih_f) + bih_f   # (T_pad, B, 3H)
    gi_b = jnp.einsum("tbi,ig->tbg", x_tm, wih_b) + bih_b

    # ---- fused block-diagonal recurrent weight + bias ----
    whh_f = jnp.asarray(params["w_hh_f"], jnp.float32).T    # (H, 3H)
    whh_b = jnp.asarray(params["w_hh_b"], jnp.float32).T
    zero = jnp.zeros((H, 3 * H), jnp.float32)
    whh_blk = jnp.concatenate(
        [jnp.concatenate([whh_f, zero], axis=1),
         jnp.concatenate([zero, whh_b], axis=1)], axis=0)   # (2H, 6H)
    bhh = jnp.concatenate([jnp.asarray(params["b_hh_f"], jnp.float32),
                           jnp.asarray(params["b_hh_b"], jnp.float32)])[None, :]

    lens = jnp.asarray(lengths_np)[:, None]                 # (B, 1) int32

    def const_spec(shape):
        return pl.BlockSpec(shape, lambda k: (0,) * len(shape))

    in_specs = [
        const_spec((B, 1)),                                       # lengths
        pl.BlockSpec((C, B, 3 * H), lambda k: (k, 0, 0)),         # gi fwd chunks
        pl.BlockSpec((C, B, 3 * H), lambda k: (K - 1 - k, 0, 0)),  # gi bwd chunks
        const_spec((2 * H, 6 * H)),                               # W_hh block-diag
        const_spec((1, 6 * H)),                                   # b_hh fused
    ]
    out_specs = [
        pl.BlockSpec((C, B, H), lambda k: (k, 0, 0)),             # fwd outputs
        pl.BlockSpec((C, B, H), lambda k: (K - 1 - k, 0, 0)),     # bwd outputs
        pl.BlockSpec((B, 2 * H), lambda k: (0, 0)),               # resident carry
    ]
    out_shape = [
        jax.ShapeDtypeStruct((T_pad, B, H), jnp.float32),
        jax.ShapeDtypeStruct((T_pad, B, H), jnp.float32),
        jax.ShapeDtypeStruct((B, 2 * H), jnp.float32),
    ]

    # explicit scoped-VMEM budget from block sizes + double buffering
    f32 = 4
    vmem_est = f32 * (2 * (2 * C * B * 3 * H + 2 * C * B * H)
                      + 2 * (2 * H * 6 * H + 6 * H + B * 2 * H + B))
    vmem_limit = int(min(max(4 * vmem_est, 8 << 20), 32 << 20))

    out_f, out_b, h_cat = pl.pallas_call(
        functools.partial(_bigru_rec_kernel, hidden_size=H, chunk=C,
                          t_total=T_pad),
        out_shape=out_shape,
        grid=(K,),
        in_specs=in_specs,
        out_specs=out_specs,
        compiler_params=pltpu.CompilerParams(
            dimension_semantics=("arbitrary",),   # sequential recurrence over T
            vmem_limit_bytes=vmem_limit),
    )(lens, gi_f, gi_b, whh_blk, bhh)

    outputs = jnp.concatenate([out_f, out_b], axis=-1)      # (T_pad, B, 2H)
    outputs = jnp.transpose(outputs, (1, 0, 2))             # (B, T_pad, 2H)
    # pad_packed_sequence pads only up to the longest sequence in the batch
    outputs = outputs[:, : int(lengths_np.max()), :]
    hidden = jnp.stack([h_cat[:, :H], h_cat[:, H:]], axis=0)  # (2, B, H)
    return outputs, hidden


# ------------------------- pure-JAX reference --------------------------------
def _gru_ref(batch, lengths, p):
    batch = jnp.asarray(batch, jnp.float32)
    lengths = np.asarray(lengths, np.int32)
    B, T, I = batch.shape
    H = p["w_hh_f"].shape[1]

    def run(wi, wh, bi, bh, reverse):
        h = jnp.zeros((B, H), jnp.float32)
        outs = [None] * T
        ts = range(T - 1, -1, -1) if reverse else range(T)
        for t in ts:
            m = jnp.asarray((lengths > t), jnp.float32)[:, None]
            gi = batch[:, t, :] @ wi + bi[None, :]
            gh = h @ wh + bh[None, :]
            r = jax.nn.sigmoid(gi[:, :H] + gh[:, :H])
            z = jax.nn.sigmoid(gi[:, H:2 * H] + gh[:, H:2 * H])
            n = jnp.tanh(gi[:, 2 * H:] + r * gh[:, 2 * H:])
            hn = (1.0 - z) * n + z * h
            outs[t] = m * hn
            h = m * hn + (1.0 - m) * h
        return jnp.stack(outs, axis=1), h

    of, hf = run(p["w_ih_f"].T, p["w_hh_f"].T, p["b_ih_f"], p["b_hh_f"], False)
    ob, hb = run(p["w_ih_b"].T, p["w_hh_b"].T, p["b_ih_b"], p["b_hh_b"], True)
    out = jnp.concatenate([of, ob], -1)[:, : int(lengths.max()), :]
    return out, jnp.stack([hf, hb], 0)


if __name__ == "__main__":
    # small shapes consistent with the module
    B, T, I, H = 3, 8, 16, 32
    key = jax.random.PRNGKey(0)
    ks = jax.random.split(key, 9)
    bound = 1.0 / np.sqrt(H)   # PyTorch GRU default init range

    def u(k, shape):
        return jax.random.uniform(k, shape, jnp.float32, -bound, bound)

    # PyTorch parameter layout: weight_ih (3H, I), weight_hh (3H, H), biases (3H,)
    params = {
        "w_ih_f": u(ks[0], (3 * H, I)), "w_hh_f": u(ks[1], (3 * H, H)),
        "b_ih_f": u(ks[2], (3 * H,)),   "b_hh_f": u(ks[3], (3 * H,)),
        "w_ih_b": u(ks[4], (3 * H, I)), "w_hh_b": u(ks[5], (3 * H, H)),
        "b_ih_b": u(ks[6], (3 * H,)),   "b_hh_b": u(ks[7], (3 * H,)),
    }

    batch = jax.random.normal(ks[8], (B, T, I), jnp.float32)
    batch_length = [8, 6, 3]   # sorted descending, as pack_padded_sequence requires

    outputs, hidden = recurrent_context_forward(batch, batch_length, params)
    outputs = jax.block_until_ready(outputs)
    hidden = jax.block_until_ready(hidden)

    ref_out, ref_hid = _gru_ref(batch, batch_length, params)
    np.testing.assert_allclose(np.asarray(outputs), np.asarray(ref_out),
                               rtol=2e-5, atol=3e-5)
    np.testing.assert_allclose(np.asarray(hidden), np.asarray(ref_hid),
                               rtol=2e-5, atol=3e-5)

    assert outputs.shape == (B, max(batch_length), 2 * H)
    assert hidden.shape == (2, B, H)
    print("KERNEL_OK")
</pallas_src>

<mosaic_0001>
module attributes {stable_mosaic.version = 11 : i64} {
  func.func @_bigru_rec_kernel(%arg0: i32, %arg1: memref<3x1xi32, #tpu.memory_space<vmem>>, %arg2: memref<8x3x96xf32, #tpu.memory_space<vmem>>, %arg3: memref<8x3x96xf32, #tpu.memory_space<vmem>>, %arg4: memref<64x192xf32, #tpu.memory_space<vmem>>, %arg5: memref<1x192xf32, #tpu.memory_space<vmem>>, %arg6: memref<8x3x32xf32, #tpu.memory_space<vmem>>, %arg7: memref<8x3x32xf32, #tpu.memory_space<vmem>>, %arg8: memref<3x64xf32, #tpu.memory_space<vmem>>) attributes {dimension_semantics = [#tpu.dimension_semantics<arbitrary>], iteration_bounds = array<i64: 1>, scalar_prefetch = 0 : i64, scratch_operands = 0 : i64, tpu.core_type = #tpu.core_type<tc>, window_params = [{pipeline_mode = #tpu.pipeline_mode<synchronous>, transform_indices = @transform_0, window_bounds = array<i64: 3, 1>}, {transform_indices = @transform_1, window_bounds = array<i64: 8, 3, 96>}, {transform_indices = @transform_2, window_bounds = array<i64: 8, 3, 96>}, {pipeline_mode = #tpu.pipeline_mode<synchronous>, transform_indices = @transform_3, window_bounds = array<i64: 64, 192>}, {pipeline_mode = #tpu.pipeline_mode<synchronous>, transform_indices = @transform_4, window_bounds = array<i64: 1, 192>}, {transform_indices = @transform_5, window_bounds = array<i64: 8, 3, 32>}, {transform_indices = @transform_6, window_bounds = array<i64: 8, 3, 32>}, {pipeline_mode = #tpu.pipeline_mode<synchronous>, transform_indices = @transform_7, window_bounds = array<i64: 3, 64>}]} {
    %c0_i32 = arith.constant 0 : i32
    %0 = arith.cmpi eq, %arg0, %c0_i32 : i32
    %1 = arith.extui %0 : i1 to i32
    %c0_i32_0 = arith.constant 0 : i32
    %2 = arith.cmpi ne, %1, %c0_i32_0 : i32
    scf.if %2 {
      %cst_178 = arith.constant 0.000000e+00 : f32
      %784 = vector.broadcast %cst_178 : f32 to vector<3x64xf32>
      %c0_179 = arith.constant 0 : index
      %c0_180 = arith.constant 0 : index
      %785 = vector.load %arg8[%c0_179, %c0_180] : memref<3x64xf32, #tpu.memory_space<vmem>>, vector<3x64xf32>
      tpu.vector_store %arg8[%c0_179, %c0_180], %784 {strides = array<i32>} : memref<3x64xf32, #tpu.memory_space<vmem>>, vector<3x64xf32>,
    } else {
    }
    %c0 = arith.constant 0 : index
    %c0_1 = arith.constant 0 : index
    %3 = vector.load %arg1[%c0, %c0_1] : memref<3x1xi32, #tpu.memory_space<vmem>>, vector<3x1xi32>
    %c0_2 = arith.constant 0 : index
    %c0_3 = arith.constant 0 : index
    %4 = vector.load %arg4[%c0_2, %c0_3] : memref<64x192xf32, #tpu.memory_space<vmem>>, vector<64x192xf32>
    %c0_4 = arith.constant 0 : index
    %c0_5 = arith.constant 0 : index
    %5 = vector.load %arg5[%c0_4, %c0_5] : memref<1x192xf32, #tpu.memory_space<vmem>>, vector<1x192xf32>
    %c0_6 = arith.constant 0 : index
    %c0_7 = arith.constant 0 : index
    %6 = vector.load %arg8[%c0_6, %c0_7] : memref<3x64xf32, #tpu.memory_space<vmem>>, vector<3x64xf32>
    %c0_i32_8 = arith.constant 0 : i32
    %c8_i32 = arith.constant 8 : i32
    %7 = arith.muli %arg0, %c8_i32 : i32
    %8 = arith.addi %7, %c0_i32_8 : i32
    %c7_i32 = arith.constant 7 : i32
    %9 = arith.subi %c7_i32, %8 : i32
    %10 = arith.index_cast %c0_i32_8 : i32 to index
    %c0_9 = arith.constant 0 : index
    %c0_10 = arith.constant 0 : index
    %11 = vector.load %arg2[%10, %c0_9, %c0_10] : memref<8x3x96xf32, #tpu.memory_space<vmem>>, vector<1x3x96xf32>
    %12 = vector.shape_cast %11 : vector<1x3x96xf32> to vector<3x96xf32>
    %c7_i32_11 = arith.constant 7 : i32
    %13 = arith.subi %c7_i32_11, %c0_i32_8 : i32
    %14 = arith.index_cast %13 : i32 to index
    %c0_12 = arith.constant 0 : index
    %c0_13 = arith.constant 0 : index
    %15 = vector.load %arg3[%14, %c0_12, %c0_13] : memref<8x3x96xf32, #tpu.memory_space<vmem>>, vector<1x3x96xf32>
    %16 = vector.shape_cast %15 : vector<1x3x96xf32> to vector<3x96xf32>
    %cst = arith.constant dense<0.000000e+00> : vector<3x192xf32>
    %17 = tpu.matmul %6, %4, %cst {dimension_numbers = #tpu.dot_dimension_numbers<[1], [0], [0], [1], [0, 0, 1, 1], [], []>} : vector<3x64xf32>, vector<64x192xf32>, vector<3x192xf32> -> vector<3x192xf32>
    %18 = vector.broadcast %5 : vector<1x192xf32> to vector<3x192xf32>
    %19 = arith.addf %17, %18 : vector<3x192xf32>
    %20 = vector.extract_strided_slice %6 {offsets = [0, 0], sizes = [3, 32], strides = [1, 1]} : vector<3x64xf32> to vector<3x32xf32>
    %21 = vector.extract_strided_slice %6 {offsets = [0, 32], sizes = [3, 32], strides = [1, 1]} : vector<3x64xf32> to vector<3x32xf32>
    %22 = vector.extract_strided_slice %19 {offsets = [0, 0], sizes = [3, 96], strides = [1, 1]} : vector<3x192xf32> to vector<3x96xf32>
    %23 = vector.extract_strided_slice %12 {offsets = [0, 0], sizes = [3, 32], strides = [1, 1]} : vector<3x96xf32> to vector<3x32xf32>
    %24 = vector.extract_strided_slice %22 {offsets = [0, 0], sizes = [3, 32], strides = [1, 1]} : vector<3x96xf32> to vector<3x32xf32>
    %25 = arith.addf %23, %24 : vector<3x32xf32>
    %26 = arith.negf %25 : vector<3x32xf32>
    %27 = math.exp %26 : vector<3x32xf32>
    %cst_14 = arith.constant 1.000000e+00 : f32
    %28 = vector.broadcast %cst_14 : f32 to vector<3x32xf32>
    %29 = arith.addf %28, %27 : vector<3x32xf32>
    %30 = arith.divf %28, %29 : vector<3x32xf32>
    %31 = vector.extract_strided_slice %12 {offsets = [0, 32], sizes = [3, 32], strides = [1, 1]} : vector<3x96xf32> to vector<3x32xf32>
    %32 = vector.extract_strided_slice %22 {offsets = [0, 32], sizes = [3, 32], strides = [1, 1]} : vector<3x96xf32> to vector<3x32xf32>
    %33 = arith.addf %31, %32 : vector<3x32xf32>
    %34 = arith.negf %33 : vector<3x32xf32>
    %35 = math.exp %34 : vector<3x32xf32>
    %cst_15 = arith.constant 1.000000e+00 : f32
    %36 = vector.broadcast %cst_15 : f32 to vector<3x32xf32>
    %37 = arith.addf %36, %35 : vector<3x32xf32>
    %38 = arith.divf %36, %37 : vector<3x32xf32>
    %39 = vector.extract_strided_slice %12 {offsets = [0, 64], sizes = [3, 32], strides = [1, 1]} : vector<3x96xf32> to vector<3x32xf32>
    %40 = vector.extract_strided_slice %22 {offsets = [0, 64], sizes = [3, 32], strides = [1, 1]} : vector<3x96xf32> to vector<3x32xf32>
    %41 = arith.mulf %30, %40 : vector<3x32xf32>
    %42 = arith.addf %39, %41 : vector<3x32xf32>
    %43 = math.tanh %42 : vector<3x32xf32>
    %cst_16 = arith.constant 1.000000e+00 : f32
    %44 = vector.broadcast %cst_16 : f32 to vector<3x32xf32>
    %45 = arith.subf %44, %38 : vector<3x32xf32>
    %46 = arith.mulf %45, %43 : vector<3x32xf32>
    %47 = arith.mulf %38, %20 : vector<3x32xf32>
    %48 = arith.addf %46, %47 : vector<3x32xf32>
    %49 = vector.extract_strided_slice %19 {offsets = [0, 96], sizes = [3, 96], strides = [1, 1]} : vector<3x192xf32> to vector<3x96xf32>
    %50 = vector.extract_strided_slice %16 {offsets = [0, 0], sizes = [3, 32], strides = [1, 1]} : vector<3x96xf32> to vector<3x32xf32>
    %51 = vector.extract_strided_slice %49 {offsets = [0, 0], sizes = [3, 32], strides = [1, 1]} : vector<3x96xf32> to vector<3x32xf32>
    %52 = arith.addf %50, %51 : vector<3x32xf32>
    %53 = arith.negf %52 : vector<3x32xf32>
    %54 = math.exp %53 : vector<3x32xf32>
    %cst_17 = arith.constant 1.000000e+00 : f32
    %55 = vector.broadcast %cst_17 : f32 to vector<3x32xf32>
    %56 = arith.addf %55, %54 : vector<3x32xf32>
    %57 = arith.divf %55, %56 : vector<3x32xf32>
    %58 = vector.extract_strided_slice %16 {offsets = [0, 32], sizes = [3, 32], strides = [1, 1]} : vector<3x96xf32> to vector<3x32xf32>
    %59 = vector.extract_strided_slice %49 {offsets = [0, 32], sizes = [3, 32], strides = [1, 1]} : vector<3x96xf32> to vector<3x32xf32>
    %60 = arith.addf %58, %59 : vector<3x32xf32>
    %61 = arith.negf %60 : vector<3x32xf32>
    %62 = math.exp %61 : vector<3x32xf32>
    %cst_18 = arith.constant 1.000000e+00 : f32
    %63 = vector.broadcast %cst_18 : f32 to vector<3x32xf32>
    %64 = arith.addf %63, %62 : vector<3x32xf32>
    %65 = arith.divf %63, %64 : vector<3x32xf32>
    %66 = vector.extract_strided_slice %16 {offsets = [0, 64], sizes = [3, 32], strides = [1, 1]} : vector<3x96xf32> to vector<3x32xf32>
    %67 = vector.extract_strided_slice %49 {offsets = [0, 64], sizes = [3, 32], strides = [1, 1]} : vector<3x96xf32> to vector<3x32xf32>
    %68 = arith.mulf %57, %67 : vector<3x32xf32>
    %69 = arith.addf %66, %68 : vector<3x32xf32>
    %70 = math.tanh %69 : vector<3x32xf32>
    %cst_19 = arith.constant 1.000000e+00 : f32
    %71 = vector.broadcast %cst_19 : f32 to vector<3x32xf32>
    %72 = arith.subf %71, %65 : vector<3x32xf32>
    %73 = arith.mulf %72, %70 : vector<3x32xf32>
    %74 = arith.mulf %65, %21 : vector<3x32xf32>
    %75 = arith.addf %73, %74 : vector<3x32xf32>
    %76 = vector.broadcast %8 : i32 to vector<3x1xi32>
    %77 = arith.cmpi slt, %76, %3 : vector<3x1xi32>
    %78 = vector.broadcast %9 : i32 to vector<3x1xi32>
    %79 = arith.cmpi slt, %78, %3 : vector<3x1xi32>
    %cst_20 = arith.constant 0.000000e+00 : f32
    %80 = vector.shape_cast %77 : vector<3x1xi1> to vector<3x1xi1>
    %81 = vector.broadcast %80 : vector<3x1xi1> to vector<3x32xi1>
    %82 = vector.broadcast %cst_20 : f32 to vector<3x32xf32>
    %83 = arith.select %81, %48, %82 : vector<3x32xi1>, vector<3x32xf32>
    %84 = arith.index_cast %c0_i32_8 : i32 to index
    %c0_21 = arith.constant 0 : index
    %c0_22 = arith.constant 0 : index
    %85 = vector.load %arg6[%84, %c0_21, %c0_22] : memref<8x3x32xf32, #tpu.memory_space<vmem>>, vector<1x3x32xf32>
    %86 = vector.shape_cast %85 : vector<1x3x32xf32> to vector<3x32xf32>
    %87 = vector.shape_cast %83 : vector<3x32xf32> to vector<1x3x32xf32>
    tpu.vector_store %arg6[%84, %c0_21, %c0_22], %87 {strides = array<i32>} : memref<8x3x32xf32, #tpu.memory_space<vmem>>, vector<1x3x32xf32>,
    %cst_23 = arith.constant 0.000000e+00 : f32
    %88 = vector.shape_cast %79 : vector<3x1xi1> to vector<3x1xi1>
    %89 = vector.broadcast %88 : vector<3x1xi1> to vector<3x32xi1>
    %90 = vector.broadcast %cst_23 : f32 to vector<3x32xf32>
    %91 = arith.select %89, %75, %90 : vector<3x32xi1>, vector<3x32xf32>
    %c7_i32_24 = arith.constant 7 : i32
    %92 = arith.subi %c7_i32_24, %c0_i32_8 : i32
    %93 = arith.index_cast %92 : i32 to index
    %c0_25 = arith.constant 0 : index
    %c0_26 = arith.constant 0 : index
    %94 = vector.load %arg7[%93, %c0_25, %c0_26] : memref<8x3x32xf32, #tpu.memory_space<vmem>>, vector<1x3x32xf32>
    %95 = vector.shape_cast %94 : vector<1x3x32xf32> to vector<3x32xf32>
    %96 = vector.shape_cast %91 : vector<3x32xf32> to vector<1x3x32xf32>
    tpu.vector_store %arg7[%93, %c0_25, %c0_26], %96 {strides = array<i32>} : memref<8x3x32xf32, #tpu.memory_space<vmem>>, vector<1x3x32xf32>,
    %97 = vector.shape_cast %77 : vector<3x1xi1> to vector<3x1xi1>
    %98 = vector.broadcast %97 : vector<3x1xi1> to vector<3x32xi1>
    %99 = arith.select %98, %48, %20 : vector<3x32xi1>, vector<3x32xf32>
    %100 = vector.shape_cast %79 : vector<3x1xi1> to vector<3x1xi1>
    %101 = vector.broadcast %100 : vector<3x1xi1> to vector<3x32xi1>
    %102 = arith.select %101, %75, %21 : vector<3x32xi1>, vector<3x32xf32>
    %103 = tpu.concatenate %99, %102 in 1 : vector<3x32xf32>, vector<3x32xf32> -> vector<3x64xf32>
    %c1_i32 = arith.constant 1 : i32
    %c8_i32_27 = arith.constant 8 : i32
    %104 = arith.muli %arg0, %c8_i32_27 : i32
    %105 = arith.addi %104, %c1_i32 : i32
    %c7_i32_28 = arith.constant 7 : i32
    %106 = arith.subi %c7_i32_28, %105 : i32
    %107 = arith.index_cast %c1_i32 : i32 to index
    %c0_29 = arith.constant 0 : index
    %c0_30 = arith.constant 0 : index
    %108 = vector.load %arg2[%107, %c0_29, %c0_30] : memref<8x3x96xf32, #tpu.memory_space<vmem>>, vector<1x3x96xf32>
    %109 = vector.shape_cast %108 : vector<1x3x96xf32> to vector<3x96xf32>
    %c7_i32_31 = arith.constant 7 : i32
    %110 = arith.subi %c7_i32_31, %c1_i32 : i32
    %111 = arith.index_cast %110 : i32 to index
    %c0_32 = arith.constant 0 : index
    %c0_33 = arith.constant 0 : index
    %112 = vector.load %arg3[%111, %c0_32, %c0_33] : memref<8x3x96xf32, #tpu.memory_space<vmem>>, vector<1x3x96xf32>
    %113 = vector.shape_cast %112 : vector<1x3x96xf32> to vector<3x96xf32>
    %cst_34 = arith.constant dense<0.000000e+00> : vector<3x192xf32>
    %114 = tpu.matmul %103, %4, %cst_34 {dimension_numbers = #tpu.dot_dimension_numbers<[1], [0], [0], [1], [0, 0, 1, 1], [], []>} : vector<3x64xf32>, vector<64x192xf32>, vector<3x192xf32> -> vector<3x192xf32>
    %115 = vector.broadcast %5 : vector<1x192xf32> to vector<3x192xf32>
    %116 = arith.addf %114, %115 : vector<3x192xf32>
    %117 = vector.extract_strided_slice %103 {offsets = [0, 0], sizes = [3, 32], strides = [1, 1]} : vector<3x64xf32> to vector<3x32xf32>
    %118 = vector.extract_strided_slice %103 {offsets = [0, 32], sizes = [3, 32], strides = [1, 1]} : vector<3x64xf32> to vector<3x32xf32>
    %119 = vector.extract_strided_slice %116 {offsets = [0, 0], sizes = [3, 96], strides = [1, 1]} : vector<3x192xf32> to vector<3x96xf32>
    %120 = vector.extract_strided_slice %109 {offsets = [0, 0], sizes = [3, 32], strides = [1, 1]} : vector<3x96xf32> to vector<3x32xf32>
    %121 = vector.extract_strided_slice %119 {offsets = [0, 0], sizes = [3, 32], strides = [1, 1]} : vector<3x96xf32> to vector<3x32xf32>
    %122 = arith.addf %120, %121 : vector<3x32xf32>
    %123 = arith.negf %122 : vector<3x32xf32>
    %124 = math.exp %123 : vector<3x32xf32>
    %cst_35 = arith.constant 1.000000e+00 : f32
    %125 = vector.broadcast %cst_35 : f32 to vector<3x32xf32>
    %126 = arith.addf %125, %124 : vector<3x32xf32>
    %127 = arith.divf %125, %126 : vector<3x32xf32>
    %128 = vector.extract_strided_slice %109 {offsets = [0, 32], sizes = [3, 32], strides = [1, 1]} : vector<3x96xf32> to vector<3x32xf32>
    %129 = vector.extract_strided_slice %119 {offsets = [0, 32], sizes = [3, 32], strides = [1, 1]} : vector<3x96xf32> to vector<3x32xf32>
    %130 = arith.addf %128, %129 : vector<3x32xf32>
    %131 = arith.negf %130 : vector<3x32xf32>
    %132 = math.exp %131 : vector<3x32xf32>
    %cst_36 = arith.constant 1.000000e+00 : f32
    %133 = vector.broadcast %cst_36 : f32 to vector<3x32xf32>
    %134 = arith.addf %133, %132 : vector<3x32xf32>
    %135 = arith.divf %133, %134 : vector<3x32xf32>
    %136 = vector.extract_strided_slice %109 {offsets = [0, 64], sizes = [3, 32], strides = [1, 1]} : vector<3x96xf32> to vector<3x32xf32>
    %137 = vector.extract_strided_slice %119 {offsets = [0, 64], sizes = [3, 32], strides = [1, 1]} : vector<3x96xf32> to vector<3x32xf32>
    %138 = arith.mulf %127, %137 : vector<3x32xf32>
    %139 = arith.addf %136, %138 : vector<3x32xf32>
    %140 = math.tanh %139 : vector<3x32xf32>
    %cst_37 = arith.constant 1.000000e+00 : f32
    %141 = vector.broadcast %cst_37 : f32 to vector<3x32xf32>
    %142 = arith.subf %141, %135 : vector<3x32xf32>
    %143 = arith.mulf %142, %140 : vector<3x32xf32>
    %144 = arith.mulf %135, %117 : vector<3x32xf32>
    %145 = arith.addf %143, %144 : vector<3x32xf32>
    %146 = vector.extract_strided_slice %116 {offsets = [0, 96], sizes = [3, 96], strides = [1, 1]} : vector<3x192xf32> to vector<3x96xf32>
    %147 = vector.extract_strided_slice %113 {offsets = [0, 0], sizes = [3, 32], strides = [1, 1]} : vector<3x96xf32> to vector<3x32xf32>
    %148 = vector.extract_strided_slice %146 {offsets = [0, 0], sizes = [3, 32], strides = [1, 1]} : vector<3x96xf32> to vector<3x32xf32>
    %149 = arith.addf %147, %148 : vector<3x32xf32>
    %150 = arith.negf %149 : vector<3x32xf32>
    %151 = math.exp %150 : vector<3x32xf32>
    %cst_38 = arith.constant 1.000000e+00 : f32
    %152 = vector.broadcast %cst_38 : f32 to vector<3x32xf32>
    %153 = arith.addf %152, %151 : vector<3x32xf32>
    %154 = arith.divf %152, %153 : vector<3x32xf32>
    %155 = vector.extract_strided_slice %113 {offsets = [0, 32], sizes = [3, 32], strides = [1, 1]} : vector<3x96xf32> to vector<3x32xf32>
    %156 = vector.extract_strided_slice %146 {offsets = [0, 32], sizes = [3, 32], strides = [1, 1]} : vector<3x96xf32> to vector<3x32xf32>
    %157 = arith.addf %155, %156 : vector<3x32xf32>
    %158 = arith.negf %157 : vector<3x32xf32>
    %159 = math.exp %158 : vector<3x32xf32>
    %cst_39 = arith.constant 1.000000e+00 : f32
    %160 = vector.broadcast %cst_39 : f32 to vector<3x32xf32>
    %161 = arith.addf %160, %159 : vector<3x32xf32>
    %162 = arith.divf %160, %161 : vector<3x32xf32>
    %163 = vector.extract_strided_slice %113 {offsets = [0, 64], sizes = [3, 32], strides = [1, 1]} : vector<3x96xf32> to vector<3x32xf32>
    %164 = vector.extract_strided_slice %146 {offsets = [0, 64], sizes = [3, 32], strides = [1, 1]} : vector<3x96xf32> to vector<3x32xf32>
    %165 = arith.mulf %154, %164 : vector<3x32xf32>
    %166 = arith.addf %163, %165 : vector<3x32xf32>
    %167 = math.tanh %166 : vector<3x32xf32>
    %cst_40 = arith.constant 1.000000e+00 : f32
    %168 = vector.broadcast %cst_40 : f32 to vector<3x32xf32>
    %169 = arith.subf %168, %162 : vector<3x32xf32>
    %170 = arith.mulf %169, %167 : vector<3x32xf32>
    %171 = arith.mulf %162, %118 : vector<3x32xf32>
    %172 = arith.addf %170, %171 : vector<3x32xf32>
    %173 = vector.broadcast %105 : i32 to vector<3x1xi32>
    %174 = arith.cmpi slt, %173, %3 : vector<3x1xi32>
    %175 = vector.broadcast %106 : i32 to vector<3x1xi32>
    %176 = arith.cmpi slt, %175, %3 : vector<3x1xi32>
    %cst_41 = arith.constant 0.000000e+00 : f32
    %177 = vector.shape_cast %174 : vector<3x1xi1> to vector<3x1xi1>
    %178 = vector.broadcast %177 : vector<3x1xi1> to vector<3x32xi1>
    %179 = vector.broadcast %cst_41 : f32 to vector<3x32xf32>
    %180 = arith.select %178, %145, %179 : vector<3x32xi1>, vector<3x32xf32>
    %181 = arith.index_cast %c1_i32 : i32 to index
    %c0_42 = arith.constant 0 : index
    %c0_43 = arith.constant 0 : index
    %182 = vector.load %arg6[%181, %c0_42, %c0_43] : memref<8x3x32xf32, #tpu.memory_space<vmem>>, vector<1x3x32xf32>
    %183 = vector.shape_cast %182 : vector<1x3x32xf32> to vector<3x32xf32>
    %184 = vector.shape_cast %180 : vector<3x32xf32> to vector<1x3x32xf32>
    tpu.vector_store %arg6[%181, %c0_42, %c0_43], %184 {strides = array<i32>} : memref<8x3x32xf32, #tpu.memory_space<vmem>>, vector<1x3x32xf32>,
    %cst_44 = arith.constant 0.000000e+00 : f32
    %185 = vector.shape_cast %176 : vector<3x1xi1> to vector<3x1xi1>
    %186 = vector.broadcast %185 : vector<3x1xi1> to vector<3x32xi1>
    %187 = vector.broadcast %cst_44 : f32 to vector<3x32xf32>
    %188 = arith.select %186, %172, %187 : vector<3x32xi1>, vector<3x32xf32>
    %c7_i32_45 = arith.constant 7 : i32
    %189 = arith.subi %c7_i32_45, %c1_i32 : i32
    %190 = arith.index_cast %189 : i32 to index
    %c0_46 = arith.constant 0 : index
    %c0_47 = arith.constant 0 : index
    %191 = vector.load %arg7[%190, %c0_46, %c0_47] : memref<8x3x32xf32, #tpu.memory_space<vmem>>, vector<1x3x32xf32>
    %192 = vector.shape_cast %191 : vector<1x3x32xf32> to vector<3x32xf32>
    %193 = vector.shape_cast %188 : vector<3x32xf32> to vector<1x3x32xf32>
    tpu.vector_store %arg7[%190, %c0_46, %c0_47], %193 {strides = array<i32>} : memref<8x3x32xf32, #tpu.memory_space<vmem>>, vector<1x3x32xf32>,
    %194 = vector.shape_cast %174 : vector<3x1xi1> to vector<3x1xi1>
    %195 = vector.broadcast %194 : vector<3x1xi1> to vector<3x32xi1>
    %196 = arith.select %195, %145, %117 : vector<3x32xi1>, vector<3x32xf32>
    %197 = vector.shape_cast %176 : vector<3x1xi1> to vector<3x1xi1>
    %198 = vector.broadcast %197 : vector<3x1xi1> to vector<3x32xi1>
    %199 = arith.select %198, %172, %118 : vector<3x32xi1>, vector<3x32xf32>
    %200 = tpu.concatenate %196, %199 in 1 : vector<3x32xf32>, vector<3x32xf32> -> vector<3x64xf32>
    %c2_i32 = arith.constant 2 : i32
    %c8_i32_48 = arith.constant 8 : i32
    %201 = arith.muli %arg0, %c8_i32_48 : i32
    %202 = arith.addi %201, %c2_i32 : i32
    %c7_i32_49 = arith.constant 7 : i32
    %203 = arith.subi %c7_i32_49, %202 : i32
    %204 = arith.index_cast %c2_i32 : i32 to index
    %c0_50 = arith.constant 0 : index
    %c0_51 = arith.constant 0 : index
    %205 = vector.load %arg2[%204, %c0_50, %c0_51] : memref<8x3x96xf32, #tpu.memory_space<vmem>>, vector<1x3x96xf32>
    %206 = vector.shape_cast %205 : vector<1x3x96xf32> to vector<3x96xf32>
    %c7_i32_52 = arith.constant 7 : i32
    %207 = arith.subi %c7_i32_52, %c2_i32 : i32
    %208 = arith.index_cast %207 : i32 to index
    %c0_53 = arith.constant 0 : index
    %c0_54 = arith.constant 0 : index
    %209 = vector.load %arg3[%208, %c0_53, %c0_54] : memref<8x3x96xf32, #tpu.memory_space<vmem>>, vector<1x3x96xf32>
    %210 = vector.shape_cast %209 : vector<1x3x96xf32> to vector<3x96xf32>
    %cst_55 = arith.constant dense<0.000000e+00> : vector<3x192xf32>
    %211 = tpu.matmul %200, %4, %cst_55 {dimension_numbers = #tpu.dot_dimension_numbers<[1], [0], [0], [1], [0, 0, 1, 1], [], []>} : vector<3x64xf32>, vector<64x192xf32>, vector<3x192xf32> -> vector<3x192xf32>
    %212 = vector.broadcast %5 : vector<1x192xf32> to vector<3x192xf32>
    %213 = arith.addf %211, %212 : vector<3x192xf32>
    %214 = vector.extract_strided_slice %200 {offsets = [0, 0], sizes = [3, 32], strides = [1, 1]} : vector<3x64xf32> to vector<3x32xf32>
    %215 = vector.extract_strided_slice %200 {offsets = [0, 32], sizes = [3, 32], strides = [1, 1]} : vector<3x64xf32> to vector<3x32xf32>
    %216 = vector.extract_strided_slice %213 {offsets = [0, 0], sizes = [3, 96], strides = [1, 1]} : vector<3x192xf32> to vector<3x96xf32>
    %217 = vector.extract_strided_slice %206 {offsets = [0, 0], sizes = [3, 32], strides = [1, 1]} : vector<3x96xf32> to vector<3x32xf32>
    %218 = vector.extract_strided_slice %216 {offsets = [0, 0], sizes = [3, 32], strides = [1, 1]} : vector<3x96xf32> to vector<3x32xf32>
    %219 = arith.addf %217, %218 : vector<3x32xf32>
    %220 = arith.negf %219 : vector<3x32xf32>
    %221 = math.exp %220 : vector<3x32xf32>
    %cst_56 = arith.constant 1.000000e+00 : f32
    %222 = vector.broadcast %cst_56 : f32 to vector<3x32xf32>
    %223 = arith.addf %222, %221 : vector<3x32xf32>
    %224 = arith.divf %222, %223 : vector<3x32xf32>
    %225 = vector.extract_strided_slice %206 {offsets = [0, 32], sizes = [3, 32], strides = [1, 1]} : vector<3x96xf32> to vector<3x32xf32>
    %226 = vector.extract_strided_slice %216 {offsets = [0, 32], sizes = [3, 32], strides = [1, 1]} : vector<3x96xf32> to vector<3x32xf32>
    %227 = arith.addf %225, %226 : vector<3x32xf32>
    %228 = arith.negf %227 : vector<3x32xf32>
    %229 = math.exp %228 : vector<3x32xf32>
    %cst_57 = arith.constant 1.000000e+00 : f32
    %230 = vector.broadcast %cst_57 : f32 to vector<3x32xf32>
    %231 = arith.addf %230, %229 : vector<3x32xf32>
    %232 = arith.divf %230, %231 : vector<3x32xf32>
    %233 = vector.extract_strided_slice %206 {offsets = [0, 64], sizes = [3, 32], strides = [1, 1]} : vector<3x96xf32> to vector<3x32xf32>
    %234 = vector.extract_strided_slice %216 {offsets = [0, 64], sizes = [3, 32], strides = [1, 1]} : vector<3x96xf32> to vector<3x32xf32>
    %235 = arith.mulf %224, %234 : vector<3x32xf32>
    %236 = arith.addf %233, %235 : vector<3x32xf32>
    %237 = math.tanh %236 : vector<3x32xf32>
    %cst_58 = arith.constant 1.000000e+00 : f32
    %238 = vector.broadcast %cst_58 : f32 to vector<3x32xf32>
    %239 = arith.subf %238, %232 : vector<3x32xf32>
    %240 = arith.mulf %239, %237 : vector<3x32xf32>
    %241 = arith.mulf %232, %214 : vector<3x32xf32>
    %242 = arith.addf %240, %241 : vector<3x32xf32>
    %243 = vector.extract_strided_slice %213 {offsets = [0, 96], sizes = [3, 96], strides = [1, 1]} : vector<3x192xf32> to vector<3x96xf32>
    %244 = vector.extract_strided_slice %210 {offsets = [0, 0], sizes = [3, 32], strides = [1, 1]} : vector<3x96xf32> to vector<3x32xf32>
    %245 = vector.extract_strided_slice %243 {offsets = [0, 0], sizes = [3, 32], strides = [1, 1]} : vector<3x96xf32> to vector<3x32xf32>
    %246 = arith.addf %244, %245 : vector<3x32xf32>
    %247 = arith.negf %246 : vector<3x32xf32>
    %248 = math.exp %247 : vector<3x32xf32>
    %cst_59 = arith.constant 1.000000e+00 : f32
    %249 = vector.broadcast %cst_59 : f32 to vector<3x32xf32>
    %250 = arith.addf %249, %248 : vector<3x32xf32>
    %251 = arith.divf %249, %250 : vector<3x32xf32>
    %252 = vector.extract_strided_slice %210 {offsets = [0, 32], sizes = [3, 32], strides = [1, 1]} : vector<3x96xf32> to vector<3x32xf32>
    %253 = vector.extract_strided_slice %243 {offsets = [0, 32], sizes = [3, 32], strides = [1, 1]} : vector<3x96xf32> to vector<3x32xf32>
    %254 = arith.addf %252, %253 : vector<3x32xf32>
    %255 = arith.negf %254 : vector<3x32xf32>
    %256 = math.exp %255 : vector<3x32xf32>
    %cst_60 = arith.constant 1.000000e+00 : f32
    %257 = vector.broadcast %cst_60 : f32 to vector<3x32xf32>
    %258 = arith.addf %257, %256 : vector<3x32xf32>
    %259 = arith.divf %257, %258 : vector<3x32xf32>
    %260 = vector.extract_strided_slice %210 {offsets = [0, 64], sizes = [3, 32], strides = [1, 1]} : vector<3x96xf32> to vector<3x32xf32>
    %261 = vector.extract_strided_slice %243 {offsets = [0, 64], sizes = [3, 32], strides = [1, 1]} : vector<3x96xf32> to vector<3x32xf32>
    %262 = arith.mulf %251, %261 : vector<3x32xf32>
    %263 = arith.addf %260, %262 : vector<3x32xf32>
    %264 = math.tanh %263 : vector<3x32xf32>
    %cst_61 = arith.constant 1.000000e+00 : f32
    %265 = vector.broadcast %cst_61 : f32 to vector<3x32xf32>
    %266 = arith.subf %265, %259 : vector<3x32xf32>
    %267 = arith.mulf %266, %264 : vector<3x32xf32>
    %268 = arith.mulf %259, %215 : vector<3x32xf32>
    %269 = arith.addf %267, %268 : vector<3x32xf32>
    %270 = vector.broadcast %202 : i32 to vector<3x1xi32>
    %271 = arith.cmpi slt, %270, %3 : vector<3x1xi32>
    %272 = vector.broadcast %203 : i32 to vector<3x1xi32>
    %273 = arith.cmpi slt, %272, %3 : vector<3x1xi32>
    %cst_62 = arith.constant 0.000000e+00 : f32
    %274 = vector.shape_cast %271 : vector<3x1xi1> to vector<3x1xi1>
    %275 = vector.broadcast %274 : vector<3x1xi1> to vector<3x32xi1>
    %276 = vector.broadcast %cst_62 : f32 to vector<3x32xf32>
    %277 = arith.select %275, %242, %276 : vector<3x32xi1>, vector<3x32xf32>
    %278 = arith.index_cast %c2_i32 : i32 to index
    %c0_63 = arith.constant 0 : index
    %c0_64 = arith.constant 0 : index
    %279 = vector.load %arg6[%278, %c0_63, %c0_64] : memref<8x3x32xf32, #tpu.memory_space<vmem>>, vector<1x3x32xf32>
    %280 = vector.shape_cast %279 : vector<1x3x32xf32> to vector<3x32xf32>
    %281 = vector.shape_cast %277 : vector<3x32xf32> to vector<1x3x32xf32>
    tpu.vector_store %arg6[%278, %c0_63, %c0_64], %281 {strides = array<i32>} : memref<8x3x32xf32, #tpu.memory_space<vmem>>, vector<1x3x32xf32>,
    %cst_65 = arith.constant 0.000000e+00 : f32
    %282 = vector.shape_cast %273 : vector<3x1xi1> to vector<3x1xi1>
    %283 = vector.broadcast %282 : vector<3x1xi1> to vector<3x32xi1>
    %284 = vector.broadcast %cst_65 : f32 to vector<3x32xf32>
    %285 = arith.select %283, %269, %284 : vector<3x32xi1>, vector<3x32xf32>
    %c7_i32_66 = arith.constant 7 : i32
    %286 = arith.subi %c7_i32_66, %c2_i32 : i32
    %287 = arith.index_cast %286 : i32 to index
    %c0_67 = arith.constant 0 : index
    %c0_68 = arith.constant 0 : index
    %288 = vector.load %arg7[%287, %c0_67, %c0_68] : memref<8x3x32xf32, #tpu.memory_space<vmem>>, vector<1x3x32xf32>
    %289 = vector.shape_cast %288 : vector<1x3x32xf32> to vector<3x32xf32>
    %290 = vector.shape_cast %285 : vector<3x32xf32> to vector<1x3x32xf32>
    tpu.vector_store %arg7[%287, %c0_67, %c0_68], %290 {strides = array<i32>} : memref<8x3x32xf32, #tpu.memory_space<vmem>>, vector<1x3x32xf32>,
    %291 = vector.shape_cast %271 : vector<3x1xi1> to vector<3x1xi1>
    %292 = vector.broadcast %291 : vector<3x1xi1> to vector<3x32xi1>
    %293 = arith.select %292, %242, %214 : vector<3x32xi1>, vector<3x32xf32>
    %294 = vector.shape_cast %273 : vector<3x1xi1> to vector<3x1xi1>
    %295 = vector.broadcast %294 : vector<3x1xi1> to vector<3x32xi1>
    %296 = arith.select %295, %269, %215 : vector<3x32xi1>, vector<3x32xf32>
    %297 = tpu.concatenate %293, %296 in 1 : vector<3x32xf32>, vector<3x32xf32> -> vector<3x64xf32>
    %c3_i32 = arith.constant 3 : i32
    %c8_i32_69 = arith.constant 8 : i32
    %298 = arith.muli %arg0, %c8_i32_69 : i32
    %299 = arith.addi %298, %c3_i32 : i32
    %c7_i32_70 = arith.constant 7 : i32
    %300 = arith.subi %c7_i32_70, %299 : i32
    %301 = arith.index_cast %c3_i32 : i32 to index
    %c0_71 = arith.constant 0 : index
    %c0_72 = arith.constant 0 : index
    %302 = vector.load %arg2[%301, %c0_71, %c0_72] : memref<8x3x96xf32, #tpu.memory_space<vmem>>, vector<1x3x96xf32>
    %303 = vector.shape_cast %302 : vector<1x3x96xf32> to vector<3x96xf32>
    %c7_i32_73 = arith.constant 7 : i32
    %304 = arith.subi %c7_i32_73, %c3_i32 : i32
    %305 = arith.index_cast %304 : i32 to index
    %c0_74 = arith.constant 0 : index
    %c0_75 = arith.constant 0 : index
    %306 = vector.load %arg3[%305, %c0_74, %c0_75] : memref<8x3x96xf32, #tpu.memory_space<vmem>>, vector<1x3x96xf32>
    %307 = vector.shape_cast %306 : vector<1x3x96xf32> to vector<3x96xf32>
    %cst_76 = arith.constant dense<0.000000e+00> : vector<3x192xf32>
    %308 = tpu.matmul %297, %4, %cst_76 {dimension_numbers = #tpu.dot_dimension_numbers<[1], [0], [0], [1], [0, 0, 1, 1], [], []>} : vector<3x64xf32>, vector<64x192xf32>, vector<3x192xf32> -> vector<3x192xf32>
    %309 = vector.broadcast %5 : vector<1x192xf32> to vector<3x192xf32>
    %310 = arith.addf %308, %309 : vector<3x192xf32>
    %311 = vector.extract_strided_slice %297 {offsets = [0, 0], sizes = [3, 32], strides = [1, 1]} : vector<3x64xf32> to vector<3x32xf32>
    %312 = vector.extract_strided_slice %297 {offsets = [0, 32], sizes = [3, 32], strides = [1, 1]} : vector<3x64xf32> to vector<3x32xf32>
    %313 = vector.extract_strided_slice %310 {offsets = [0, 0], sizes = [3, 96], strides = [1, 1]} : vector<3x192xf32> to vector<3x96xf32>
    %314 = vector.extract_strided_slice %303 {offsets = [0, 0], sizes = [3, 32], strides = [1, 1]} : vector<3x96xf32> to vector<3x32xf32>
    %315 = vector.extract_strided_slice %313 {offsets = [0, 0], sizes = [3, 32], strides = [1, 1]} : vector<3x96xf32> to vector<3x32xf32>
    %316 = arith.addf %314, %315 : vector<3x32xf32>
    %317 = arith.negf %316 : vector<3x32xf32>
    %318 = math.exp %317 : vector<3x32xf32>
    %cst_77 = arith.constant 1.000000e+00 : f32
    %319 = vector.broadcast %cst_77 : f32 to vector<3x32xf32>
    %320 = arith.addf %319, %318 : vector<3x32xf32>
    %321 = arith.divf %319, %320 : vector<3x32xf32>
    %322 = vector.extract_strided_slice %303 {offsets = [0, 32], sizes = [3, 32], strides = [1, 1]} : vector<3x96xf32> to vector<3x32xf32>
    %323 = vector.extract_strided_slice %313 {offsets = [0, 32], sizes = [3, 32], strides = [1, 1]} : vector<3x96xf32> to vector<3x32xf32>
    %324 = arith.addf %322, %323 : vector<3x32xf32>
    %325 = arith.negf %324 : vector<3x32xf32>
    %326 = math.exp %325 : vector<3x32xf32>
    %cst_78 = arith.constant 1.000000e+00 : f32
    %327 = vector.broadcast %cst_78 : f32 to vector<3x32xf32>
    %328 = arith.addf %327, %326 : vector<3x32xf32>
    %329 = arith.divf %327, %328 : vector<3x32xf32>
    %330 = vector.extract_strided_slice %303 {offsets = [0, 64], sizes = [3, 32], strides = [1, 1]} : vector<3x96xf32> to vector<3x32xf32>
    %331 = vector.extract_strided_slice %313 {offsets = [0, 64], sizes = [3, 32], strides = [1, 1]} : vector<3x96xf32> to vector<3x32xf32>
    %332 = arith.mulf %321, %331 : vector<3x32xf32>
    %333 = arith.addf %330, %332 : vector<3x32xf32>
    %334 = math.tanh %333 : vector<3x32xf32>
    %cst_79 = arith.constant 1.000000e+00 : f32
    %335 = vector.broadcast %cst_79 : f32 to vector<3x32xf32>
    %336 = arith.subf %335, %329 : vector<3x32xf32>
    %337 = arith.mulf %336, %334 : vector<3x32xf32>
    %338 = arith.mulf %329, %311 : vector<3x32xf32>
    %339 = arith.addf %337, %338 : vector<3x32xf32>
    %340 = vector.extract_strided_slice %310 {offsets = [0, 96], sizes = [3, 96], strides = [1, 1]} : vector<3x192xf32> to vector<3x96xf32>
    %341 = vector.extract_strided_slice %307 {offsets = [0, 0], sizes = [3, 32], strides = [1, 1]} : vector<3x96xf32> to vector<3x32xf32>
    %342 = vector.extract_strided_slice %340 {offsets = [0, 0], sizes = [3, 32], strides = [1, 1]} : vector<3x96xf32> to vector<3x32xf32>
    %343 = arith.addf %341, %342 : vector<3x32xf32>
    %344 = arith.negf %343 : vector<3x32xf32>
    %345 = math.exp %344 : vector<3x32xf32>
    %cst_80 = arith.constant 1.000000e+00 : f32
    %346 = vector.broadcast %cst_80 : f32 to vector<3x32xf32>
    %347 = arith.addf %346, %345 : vector<3x32xf32>
    %348 = arith.divf %346, %347 : vector<3x32xf32>
    %349 = vector.extract_strided_slice %307 {offsets = [0, 32], sizes = [3, 32], strides = [1, 1]} : vector<3x96xf32> to vector<3x32xf32>
    %350 = vector.extract_strided_slice %340 {offsets = [0, 32], sizes = [3, 32], strides = [1, 1]} : vector<3x96xf32> to vector<3x32xf32>
    %351 = arith.addf %349, %350 : vector<3x32xf32>
    %352 = arith.negf %351 : vector<3x32xf32>
    %353 = math.exp %352 : vector<3x32xf32>
    %cst_81 = arith.constant 1.000000e+00 : f32
    %354 = vector.broadcast %cst_81 : f32 to vector<3x32xf32>
    %355 = arith.addf %354, %353 : vector<3x32xf32>
    %356 = arith.divf %354, %355 : vector<3x32xf32>
    %357 = vector.extract_strided_slice %307 {offsets = [0, 64], sizes = [3, 32], strides = [1, 1]} : vector<3x96xf32> to vector<3x32xf32>
    %358 = vector.extract_strided_slice %340 {offsets = [0, 64], sizes = [3, 32], strides = [1, 1]} : vector<3x96xf32> to vector<3x32xf32>
    %359 = arith.mulf %348, %358 : vector<3x32xf32>
    %360 = arith.addf %357, %359 : vector<3x32xf32>
    %361 = math.tanh %360 : vector<3x32xf32>
    %cst_82 = arith.constant 1.000000e+00 : f32
    %362 = vector.broadcast %cst_82 : f32 to vector<3x32xf32>
    %363 = arith.subf %362, %356 : vector<3x32xf32>
    %364 = arith.mulf %363, %361 : vector<3x32xf32>
    %365 = arith.mulf %356, %312 : vector<3x32xf32>
    %366 = arith.addf %364, %365 : vector<3x32xf32>
    %367 = vector.broadcast %299 : i32 to vector<3x1xi32>
    %368 = arith.cmpi slt, %367, %3 : vector<3x1xi32>
    %369 = vector.broadcast %300 : i32 to vector<3x1xi32>
    %370 = arith.cmpi slt, %369, %3 : vector<3x1xi32>
    %cst_83 = arith.constant 0.000000e+00 : f32
    %371 = vector.shape_cast %368 : vector<3x1xi1> to vector<3x1xi1>
    %372 = vector.broadcast %371 : vector<3x1xi1> to vector<3x32xi1>
    %373 = vector.broadcast %cst_83 : f32 to vector<3x32xf32>
    %374 = arith.select %372, %339, %373 : vector<3x32xi1>, vector<3x32xf32>
    %375 = arith.index_cast %c3_i32 : i32 to index
    %c0_84 = arith.constant 0 : index
    %c0_85 = arith.constant 0 : index
    %376 = vector.load %arg6[%375, %c0_84, %c0_85] : memref<8x3x32xf32, #tpu.memory_space<vmem>>, vector<1x3x32xf32>
    %377 = vector.shape_cast %376 : vector<1x3x32xf32> to vector<3x32xf32>
    %378 = vector.shape_cast %374 : vector<3x32xf32> to vector<1x3x32xf32>
    tpu.vector_store %arg6[%375, %c0_84, %c0_85], %378 {strides = array<i32>} : memref<8x3x32xf32, #tpu.memory_space<vmem>>, vector<1x3x32xf32>,
    %cst_86 = arith.constant 0.000000e+00 : f32
    %379 = vector.shape_cast %370 : vector<3x1xi1> to vector<3x1xi1>
    %380 = vector.broadcast %379 : vector<3x1xi1> to vector<3x32xi1>
    %381 = vector.broadcast %cst_86 : f32 to vector<3x32xf32>
    %382 = arith.select %380, %366, %381 : vector<3x32xi1>, vector<3x32xf32>
    %c7_i32_87 = arith.constant 7 : i32
    %383 = arith.subi %c7_i32_87, %c3_i32 : i32
    %384 = arith.index_cast %383 : i32 to index
    %c0_88 = arith.constant 0 : index
    %c0_89 = arith.constant 0 : index
    %385 = vector.load %arg7[%384, %c0_88, %c0_89] : memref<8x3x32xf32, #tpu.memory_space<vmem>>, vector<1x3x32xf32>
    %386 = vector.shape_cast %385 : vector<1x3x32xf32> to vector<3x32xf32>
    %387 = vector.shape_cast %382 : vector<3x32xf32> to vector<1x3x32xf32>
    tpu.vector_store %arg7[%384, %c0_88, %c0_89], %387 {strides = array<i32>} : memref<8x3x32xf32, #tpu.memory_space<vmem>>, vector<1x3x32xf32>,
    %388 = vector.shape_cast %368 : vector<3x1xi1> to vector<3x1xi1>
    %389 = vector.broadcast %388 : vector<3x1xi1> to vector<3x32xi1>
    %390 = arith.select %389, %339, %311 : vector<3x32xi1>, vector<3x32xf32>
    %391 = vector.shape_cast %370 : vector<3x1xi1> to vector<3x1xi1>
    %392 = vector.broadcast %391 : vector<3x1xi1> to vector<3x32xi1>
    %393 = arith.select %392, %366, %312 : vector<3x32xi1>, vector<3x32xf32>
    %394 = tpu.concatenate %390, %393 in 1 : vector<3x32xf32>, vector<3x32xf32> -> vector<3x64xf32>
    %c4_i32 = arith.constant 4 : i32
    %c8_i32_90 = arith.constant 8 : i32
    %395 = arith.muli %arg0, %c8_i32_90 : i32
    %396 = arith.addi %395, %c4_i32 : i32
    %c7_i32_91 = arith.constant 7 : i32
    %397 = arith.subi %c7_i32_91, %396 : i32
    %398 = arith.index_cast %c4_i32 : i32 to index
    %c0_92 = arith.constant 0 : index
    %c0_93 = arith.constant 0 : index
    %399 = vector.load %arg2[%398, %c0_92, %c0_93] : memref<8x3x96xf32, #tpu.memory_space<vmem>>, vector<1x3x96xf32>
    %400 = vector.shape_cast %399 : vector<1x3x96xf32> to vector<3x96xf32>
    %c7_i32_94 = arith.constant 7 : i32
    %401 = arith.subi %c7_i32_94, %c4_i32 : i32
    %402 = arith.index_cast %401 : i32 to index
    %c0_95 = arith.constant 0 : index
    %c0_96 = arith.constant 0 : index
    %403 = vector.load %arg3[%402, %c0_95, %c0_96] : memref<8x3x96xf32, #tpu.memory_space<vmem>>, vector<1x3x96xf32>
    %404 = vector.shape_cast %403 : vector<1x3x96xf32> to vector<3x96xf32>
    %cst_97 = arith.constant dense<0.000000e+00> : vector<3x192xf32>
    %405 = tpu.matmul %394, %4, %cst_97 {dimension_numbers = #tpu.dot_dimension_numbers<[1], [0], [0], [1], [0, 0, 1, 1], [], []>} : vector<3x64xf32>, vector<64x192xf32>, vector<3x192xf32> -> vector<3x192xf32>
    %406 = vector.broadcast %5 : vector<1x192xf32> to vector<3x192xf32>
    %407 = arith.addf %405, %406 : vector<3x192xf32>
    %408 = vector.extract_strided_slice %394 {offsets = [0, 0], sizes = [3, 32], strides = [1, 1]} : vector<3x64xf32> to vector<3x32xf32>
    %409 = vector.extract_strided_slice %394 {offsets = [0, 32], sizes = [3, 32], strides = [1, 1]} : vector<3x64xf32> to vector<3x32xf32>
    %410 = vector.extract_strided_slice %407 {offsets = [0, 0], sizes = [3, 96], strides = [1, 1]} : vector<3x192xf32> to vector<3x96xf32>
    %411 = vector.extract_strided_slice %400 {offsets = [0, 0], sizes = [3, 32], strides = [1, 1]} : vector<3x96xf32> to vector<3x32xf32>
    %412 = vector.extract_strided_slice %410 {offsets = [0, 0], sizes = [3, 32], strides = [1, 1]} : vector<3x96xf32> to vector<3x32xf32>
    %413 = arith.addf %411, %412 : vector<3x32xf32>
    %414 = arith.negf %413 : vector<3x32xf32>
    %415 = math.exp %414 : vector<3x32xf32>
    %cst_98 = arith.constant 1.000000e+00 : f32
    %416 = vector.broadcast %cst_98 : f32 to vector<3x32xf32>
    %417 = arith.addf %416, %415 : vector<3x32xf32>
    %418 = arith.divf %416, %417 : vector<3x32xf32>
    %419 = vector.extract_strided_slice %400 {offsets = [0, 32], sizes = [3, 32], strides = [1, 1]} : vector<3x96xf32> to vector<3x32xf32>
    %420 = vector.extract_strided_slice %410 {offsets = [0, 32], sizes = [3, 32], strides = [1, 1]} : vector<3x96xf32> to vector<3x32xf32>
    %421 = arith.addf %419, %420 : vector<3x32xf32>
    %422 = arith.negf %421 : vector<3x32xf32>
    %423 = math.exp %422 : vector<3x32xf32>
    %cst_99 = arith.constant 1.000000e+00 : f32
    %424 = vector.broadcast %cst_99 : f32 to vector<3x32xf32>
    %425 = arith.addf %424, %423 : vector<3x32xf32>
    %426 = arith.divf %424, %425 : vector<3x32xf32>
    %427 = vector.extract_strided_slice %400 {offsets = [0, 64], sizes = [3, 32], strides = [1, 1]} : vector<3x96xf32> to vector<3x32xf32>
    %428 = vector.extract_strided_slice %410 {offsets = [0, 64], sizes = [3, 32], strides = [1, 1]} : vector<3x96xf32> to vector<3x32xf32>
    %429 = arith.mulf %418, %428 : vector<3x32xf32>
    %430 = arith.addf %427, %429 : vector<3x32xf32>
    %431 = math.tanh %430 : vector<3x32xf32>
    %cst_100 = arith.constant 1.000000e+00 : f32
    %432 = vector.broadcast %cst_100 : f32 to vector<3x32xf32>
    %433 = arith.subf %432, %426 : vector<3x32xf32>
    %434 = arith.mulf %433, %431 : vector<3x32xf32>
    %435 = arith.mulf %426, %408 : vector<3x32xf32>
    %436 = arith.addf %434, %435 : vector<3x32xf32>
    %437 = vector.extract_strided_slice %407 {offsets = [0, 96], sizes = [3, 96], strides = [1, 1]} : vector<3x192xf32> to vector<3x96xf32>
    %438 = vector.extract_strided_slice %404 {offsets = [0, 0], sizes = [3, 32], strides = [1, 1]} : vector<3x96xf32> to vector<3x32xf32>
    %439 = vector.extract_strided_slice %437 {offsets = [0, 0], sizes = [3, 32], strides = [1, 1]} : vector<3x96xf32> to vector<3x32xf32>
    %440 = arith.addf %438, %439 : vector<3x32xf32>
    %441 = arith.negf %440 : vector<3x32xf32>
    %442 = math.exp %441 : vector<3x32xf32>
    %cst_101 = arith.constant 1.000000e+00 : f32
    %443 = vector.broadcast %cst_101 : f32 to vector<3x32xf32>
    %444 = arith.addf %443, %442 : vector<3x32xf32>
    %445 = arith.divf %443, %444 : vector<3x32xf32>
    %446 = vector.extract_strided_slice %404 {offsets = [0, 32], sizes = [3, 32], strides = [1, 1]} : vector<3x96xf32> to vector<3x32xf32>
    %447 = vector.extract_strided_slice %437 {offsets = [0, 32], sizes = [3, 32], strides = [1, 1]} : vector<3x96xf32> to vector<3x32xf32>
    %448 = arith.addf %446, %447 : vector<3x32xf32>
    %449 = arith.negf %448 : vector<3x32xf32>
    %450 = math.exp %449 : vector<3x32xf32>
    %cst_102 = arith.constant 1.000000e+00 : f32
    %451 = vector.broadcast %cst_102 : f32 to vector<3x32xf32>
    %452 = arith.addf %451, %450 : vector<3x32xf32>
    %453 = arith.divf %451, %452 : vector<3x32xf32>
    %454 = vector.extract_strided_slice %404 {offsets = [0, 64], sizes = [3, 32], strides = [1, 1]} : vector<3x96xf32> to vector<3x32xf32>
    %455 = vector.extract_strided_slice %437 {offsets = [0, 64], sizes = [3, 32], strides = [1, 1]} : vector<3x96xf32> to vector<3x32xf32>
    %456 = arith.mulf %445, %455 : vector<3x32xf32>
    %457 = arith.addf %454, %456 : vector<3x32xf32>
    %458 = math.tanh %457 : vector<3x32xf32>
    %cst_103 = arith.constant 1.000000e+00 : f32
    %459 = vector.broadcast %cst_103 : f32 to vector<3x32xf32>
    %460 = arith.subf %459, %453 : vector<3x32xf32>
    %461 = arith.mulf %460, %458 : vector<3x32xf32>
    %462 = arith.mulf %453, %409 : vector<3x32xf32>
    %463 = arith.addf %461, %462 : vector<3x32xf32>
    %464 = vector.broadcast %396 : i32 to vector<3x1xi32>
    %465 = arith.cmpi slt, %464, %3 : vector<3x1xi32>
    %466 = vector.broadcast %397 : i32 to vector<3x1xi32>
    %467 = arith.cmpi slt, %466, %3 : vector<3x1xi32>
    %cst_104 = arith.constant 0.000000e+00 : f32
    %468 = vector.shape_cast %465 : vector<3x1xi1> to vector<3x1xi1>
    %469 = vector.broadcast %468 : vector<3x1xi1> to vector<3x32xi1>
    %470 = vector.broadcast %cst_104 : f32 to vector<3x32xf32>
    %471 = arith.select %469, %436, %470 : vector<3x32xi1>, vector<3x32xf32>
    %472 = arith.index_cast %c4_i32 : i32 to index
    %c0_105 = arith.constant 0 : index
    %c0_106 = arith.constant 0 : index
    %473 = vector.load %arg6[%472, %c0_105, %c0_106] : memref<8x3x32xf32, #tpu.memory_space<vmem>>, vector<1x3x32xf32>
    %474 = vector.shape_cast %473 : vector<1x3x32xf32> to vector<3x32xf32>
    %475 = vector.shape_cast %471 : vector<3x32xf32> to vector<1x3x32xf32>
    tpu.vector_store %arg6[%472, %c0_105, %c0_106], %475 {strides = array<i32>} : memref<8x3x32xf32, #tpu.memory_space<vmem>>, vector<1x3x32xf32>,
    %cst_107 = arith.constant 0.000000e+00 : f32
    %476 = vector.shape_cast %467 : vector<3x1xi1> to vector<3x1xi1>
    %477 = vector.broadcast %476 : vector<3x1xi1> to vector<3x32xi1>
    %478 = vector.broadcast %cst_107 : f32 to vector<3x32xf32>
    %479 = arith.select %477, %463, %478 : vector<3x32xi1>, vector<3x32xf32>
    %c7_i32_108 = arith.constant 7 : i32
    %480 = arith.subi %c7_i32_108, %c4_i32 : i32
    %481 = arith.index_cast %480 : i32 to index
    %c0_109 = arith.constant 0 : index
    %c0_110 = arith.constant 0 : index
    %482 = vector.load %arg7[%481, %c0_109, %c0_110] : memref<8x3x32xf32, #tpu.memory_space<vmem>>, vector<1x3x32xf32>
    %483 = vector.shape_cast %482 : vector<1x3x32xf32> to vector<3x32xf32>
    %484 = vector.shape_cast %479 : vector<3x32xf32> to vector<1x3x32xf32>
    tpu.vector_store %arg7[%481, %c0_109, %c0_110], %484 {strides = array<i32>} : memref<8x3x32xf32, #tpu.memory_space<vmem>>, vector<1x3x32xf32>,
    %485 = vector.shape_cast %465 : vector<3x1xi1> to vector<3x1xi1>
    %486 = vector.broadcast %485 : vector<3x1xi1> to vector<3x32xi1>
    %487 = arith.select %486, %436, %408 : vector<3x32xi1>, vector<3x32xf32>
    %488 = vector.shape_cast %467 : vector<3x1xi1> to vector<3x1xi1>
    %489 = vector.broadcast %488 : vector<3x1xi1> to vector<3x32xi1>
    %490 = arith.select %489, %463, %409 : vector<3x32xi1>, vector<3x32xf32>
    %491 = tpu.concatenate %487, %490 in 1 : vector<3x32xf32>, vector<3x32xf32> -> vector<3x64xf32>
    %c5_i32 = arith.constant 5 : i32
    %c8_i32_111 = arith.constant 8 : i32
    %492 = arith.muli %arg0, %c8_i32_111 : i32
    %493 = arith.addi %492, %c5_i32 : i32
    %c7_i32_112 = arith.constant 7 : i32
    %494 = arith.subi %c7_i32_112, %493 : i32
    %495 = arith.index_cast %c5_i32 : i32 to index
    %c0_113 = arith.constant 0 : index
    %c0_114 = arith.constant 0 : index
    %496 = vector.load %arg2[%495, %c0_113, %c0_114] : memref<8x3x96xf32, #tpu.memory_space<vmem>>, vector<1x3x96xf32>
    %497 = vector.shape_cast %496 : vector<1x3x96xf32> to vector<3x96xf32>
    %c7_i32_115 = arith.constant 7 : i32
    %498 = arith.subi %c7_i32_115, %c5_i32 : i32
    %499 = arith.index_cast %498 : i32 to index
    %c0_116 = arith.constant 0 : index
    %c0_117 = arith.constant 0 : index
    %500 = vector.load %arg3[%499, %c0_116, %c0_117] : memref<8x3x96xf32, #tpu.memory_space<vmem>>, vector<1x3x96xf32>
    %501 = vector.shape_cast %500 : vector<1x3x96xf32> to vector<3x96xf32>
    %cst_118 = arith.constant dense<0.000000e+00> : vector<3x192xf32>
    %502 = tpu.matmul %491, %4, %cst_118 {dimension_numbers = #tpu.dot_dimension_numbers<[1], [0], [0], [1], [0, 0, 1, 1], [], []>} : vector<3x64xf32>, vector<64x192xf32>, vector<3x192xf32> -> vector<3x192xf32>
    %503 = vector.broadcast %5 : vector<1x192xf32> to vector<3x192xf32>
    %504 = arith.addf %502, %503 : vector<3x192xf32>
    %505 = vector.extract_strided_slice %491 {offsets = [0, 0], sizes = [3, 32], strides = [1, 1]} : vector<3x64xf32> to vector<3x32xf32>
    %506 = vector.extract_strided_slice %491 {offsets = [0, 32], sizes = [3, 32], strides = [1, 1]} : vector<3x64xf32> to vector<3x32xf32>
    %507 = vector.extract_strided_slice %504 {offsets = [0, 0], sizes = [3, 96], strides = [1, 1]} : vector<3x192xf32> to vector<3x96xf32>
    %508 = vector.extract_strided_slice %497 {offsets = [0, 0], sizes = [3, 32], strides = [1, 1]} : vector<3x96xf32> to vector<3x32xf32>
    %509 = vector.extract_strided_slice %507 {offsets = [0, 0], sizes = [3, 32], strides = [1, 1]} : vector<3x96xf32> to vector<3x32xf32>
    %510 = arith.addf %508, %509 : vector<3x32xf32>
    %511 = arith.negf %510 : vector<3x32xf32>
    %512 = math.exp %511 : vector<3x32xf32>
    %cst_119 = arith.constant 1.000000e+00 : f32
    %513 = vector.broadcast %cst_119 : f32 to vector<3x32xf32>
    %514 = arith.addf %513, %512 : vector<3x32xf32>
    %515 = arith.divf %513, %514 : vector<3x32xf32>
    %516 = vector.extract_strided_slice %497 {offsets = [0, 32], sizes = [3, 32], strides = [1, 1]} : vector<3x96xf32> to vector<3x32xf32>
    %517 = vector.extract_strided_slice %507 {offsets = [0, 32], sizes = [3, 32], strides = [1, 1]} : vector<3x96xf32> to vector<3x32xf32>
    %518 = arith.addf %516, %517 : vector<3x32xf32>
    %519 = arith.negf %518 : vector<3x32xf32>
    %520 = math.exp %519 : vector<3x32xf32>
    %cst_120 = arith.constant 1.000000e+00 : f32
    %521 = vector.broadcast %cst_120 : f32 to vector<3x32xf32>
    %522 = arith.addf %521, %520 : vector<3x32xf32>
    %523 = arith.divf %521, %522 : vector<3x32xf32>
    %524 = vector.extract_strided_slice %497 {offsets = [0, 64], sizes = [3, 32], strides = [1, 1]} : vector<3x96xf32> to vector<3x32xf32>
    %525 = vector.extract_strided_slice %507 {offsets = [0, 64], sizes = [3, 32], strides = [1, 1]} : vector<3x96xf32> to vector<3x32xf32>
    %526 = arith.mulf %515, %525 : vector<3x32xf32>
    %527 = arith.addf %524, %526 : vector<3x32xf32>
    %528 = math.tanh %527 : vector<3x32xf32>
    %cst_121 = arith.constant 1.000000e+00 : f32
    %529 = vector.broadcast %cst_121 : f32 to vector<3x32xf32>
    %530 = arith.subf %529, %523 : vector<3x32xf32>
    %531 = arith.mulf %530, %528 : vector<3x32xf32>
    %532 = arith.mulf %523, %505 : vector<3x32xf32>
    %533 = arith.addf %531, %532 : vector<3x32xf32>
    %534 = vector.extract_strided_slice %504 {offsets = [0, 96], sizes = [3, 96], strides = [1, 1]} : vector<3x192xf32> to vector<3x96xf32>
    %535 = vector.extract_strided_slice %501 {offsets = [0, 0], sizes = [3, 32], strides = [1, 1]} : vector<3x96xf32> to vector<3x32xf32>
    %536 = vector.extract_strided_slice %534 {offsets = [0, 0], sizes = [3, 32], strides = [1, 1]} : vector<3x96xf32> to vector<3x32xf32>
    %537 = arith.addf %535, %536 : vector<3x32xf32>
    %538 = arith.negf %537 : vector<3x32xf32>
    %539 = math.exp %538 : vector<3x32xf32>
    %cst_122 = arith.constant 1.000000e+00 : f32
    %540 = vector.broadcast %cst_122 : f32 to vector<3x32xf32>
    %541 = arith.addf %540, %539 : vector<3x32xf32>
    %542 = arith.divf %540, %541 : vector<3x32xf32>
    %543 = vector.extract_strided_slice %501 {offsets = [0, 32], sizes = [3, 32], strides = [1, 1]} : vector<3x96xf32> to vector<3x32xf32>
    %544 = vector.extract_strided_slice %534 {offsets = [0, 32], sizes = [3, 32], strides = [1, 1]} : vector<3x96xf32> to vector<3x32xf32>
    %545 = arith.addf %543, %544 : vector<3x32xf32>
    %546 = arith.negf %545 : vector<3x32xf32>
    %547 = math.exp %546 : vector<3x32xf32>
    %cst_123 = arith.constant 1.000000e+00 : f32
    %548 = vector.broadcast %cst_123 : f32 to vector<3x32xf32>
    %549 = arith.addf %548, %547 : vector<3x32xf32>
    %550 = arith.divf %548, %549 : vector<3x32xf32>
    %551 = vector.extract_strided_slice %501 {offsets = [0, 64], sizes = [3, 32], strides = [1, 1]} : vector<3x96xf32> to vector<3x32xf32>
    %552 = vector.extract_strided_slice %534 {offsets = [0, 64], sizes = [3, 32], strides = [1, 1]} : vector<3x96xf32> to vector<3x32xf32>
    %553 = arith.mulf %542, %552 : vector<3x32xf32>
    %554 = arith.addf %551, %553 : vector<3x32xf32>
    %555 = math.tanh %554 : vector<3x32xf32>
    %cst_124 = arith.constant 1.000000e+00 : f32
    %556 = vector.broadcast %cst_124 : f32 to vector<3x32xf32>
    %557 = arith.subf %556, %550 : vector<3x32xf32>
    %558 = arith.mulf %557, %555 : vector<3x32xf32>
    %559 = arith.mulf %550, %506 : vector<3x32xf32>
    %560 = arith.addf %558, %559 : vector<3x32xf32>
    %561 = vector.broadcast %493 : i32 to vector<3x1xi32>
    %562 = arith.cmpi slt, %561, %3 : vector<3x1xi32>
    %563 = vector.broadcast %494 : i32 to vector<3x1xi32>
    %564 = arith.cmpi slt, %563, %3 : vector<3x1xi32>
    %cst_125 = arith.constant 0.000000e+00 : f32
    %565 = vector.shape_cast %562 : vector<3x1xi1> to vector<3x1xi1>
    %566 = vector.broadcast %565 : vector<3x1xi1> to vector<3x32xi1>
    %567 = vector.broadcast %cst_125 : f32 to vector<3x32xf32>
    %568 = arith.select %566, %533, %567 : vector<3x32xi1>, vector<3x32xf32>
    %569 = arith.index_cast %c5_i32 : i32 to index
    %c0_126 = arith.constant 0 : index
    %c0_127 = arith.constant 0 : index
    %570 = vector.load %arg6[%569, %c0_126, %c0_127] : memref<8x3x32xf32, #tpu.memory_space<vmem>>, vector<1x3x32xf32>
    %571 = vector.shape_cast %570 : vector<1x3x32xf32> to vector<3x32xf32>
    %572 = vector.shape_cast %568 : vector<3x32xf32> to vector<1x3x32xf32>
    tpu.vector_store %arg6[%569, %c0_126, %c0_127], %572 {strides = array<i32>} : memref<8x3x32xf32, #tpu.memory_space<vmem>>, vector<1x3x32xf32>,
    %cst_128 = arith.constant 0.000000e+00 : f32
    %573 = vector.shape_cast %564 : vector<3x1xi1> to vector<3x1xi1>
    %574 = vector.broadcast %573 : vector<3x1xi1> to vector<3x32xi1>
    %575 = vector.broadcast %cst_128 : f32 to vector<3x32xf32>
    %576 = arith.select %574, %560, %575 : vector<3x32xi1>, vector<3x32xf32>
    %c7_i32_129 = arith.constant 7 : i32
    %577 = arith.subi %c7_i32_129, %c5_i32 : i32
    %578 = arith.index_cast %577 : i32 to index
    %c0_130 = arith.constant 0 : index
    %c0_131 = arith.constant 0 : index
    %579 = vector.load %arg7[%578, %c0_130, %c0_131] : memref<8x3x32xf32, #tpu.memory_space<vmem>>, vector<1x3x32xf32>
    %580 = vector.shape_cast %579 : vector<1x3x32xf32> to vector<3x32xf32>
    %581 = vector.shape_cast %576 : vector<3x32xf32> to vector<1x3x32xf32>
    tpu.vector_store %arg7[%578, %c0_130, %c0_131], %581 {strides = array<i32>} : memref<8x3x32xf32, #tpu.memory_space<vmem>>, vector<1x3x32xf32>,
    %582 = vector.shape_cast %562 : vector<3x1xi1> to vector<3x1xi1>
    %583 = vector.broadcast %582 : vector<3x1xi1> to vector<3x32xi1>
    %584 = arith.select %583, %533, %505 : vector<3x32xi1>, vector<3x32xf32>
    %585 = vector.shape_cast %564 : vector<3x1xi1> to vector<3x1xi1>
    %586 = vector.broadcast %585 : vector<3x1xi1> to vector<3x32xi1>
    %587 = arith.select %586, %560, %506 : vector<3x32xi1>, vector<3x32xf32>
    %588 = tpu.concatenate %584, %587 in 1 : vector<3x32xf32>, vector<3x32xf32> -> vector<3x64xf32>
    %c6_i32 = arith.constant 6 : i32
    %c8_i32_132 = arith.constant 8 : i32
    %589 = arith.muli %arg0, %c8_i32_132 : i32
    %590 = arith.addi %589, %c6_i32 : i32
    %c7_i32_133 = arith.constant 7 : i32
    %591 = arith.subi %c7_i32_133, %590 : i32
    %592 = arith.index_cast %c6_i32 : i32 to index
    %c0_134 = arith.constant 0 : index
    %c0_135 = arith.constant 0 : index
    %593 = vector.load %arg2[%592, %c0_134, %c0_135] : memref<8x3x96xf32, #tpu.memory_space<vmem>>, vector<1x3x96xf32>
    %594 = vector.shape_cast %593 : vector<1x3x96xf32> to vector<3x96xf32>
    %c7_i32_136 = arith.constant 7 : i32
    %595 = arith.subi %c7_i32_136, %c6_i32 : i32
    %596 = arith.index_cast %595 : i32 to index
    %c0_137 = arith.constant 0 : index
    %c0_138 = arith.constant 0 : index
    %597 = vector.load %arg3[%596, %c0_137, %c0_138] : memref<8x3x96xf32, #tpu.memory_space<vmem>>, vector<1x3x96xf32>
    %598 = vector.shape_cast %597 : vector<1x3x96xf32> to vector<3x96xf32>
    %cst_139 = arith.constant dense<0.000000e+00> : vector<3x192xf32>
    %599 = tpu.matmul %588, %4, %cst_139 {dimension_numbers = #tpu.dot_dimension_numbers<[1], [0], [0], [1], [0, 0, 1, 1], [], []>} : vector<3x64xf32>, vector<64x192xf32>, vector<3x192xf32> -> vector<3x192xf32>
    %600 = vector.broadcast %5 : vector<1x192xf32> to vector<3x192xf32>
    %601 = arith.addf %599, %600 : vector<3x192xf32>
    %602 = vector.extract_strided_slice %588 {offsets = [0, 0], sizes = [3, 32], strides = [1, 1]} : vector<3x64xf32> to vector<3x32xf32>
    %603 = vector.extract_strided_slice %588 {offsets = [0, 32], sizes = [3, 32], strides = [1, 1]} : vector<3x64xf32> to vector<3x32xf32>
    %604 = vector.extract_strided_slice %601 {offsets = [0, 0], sizes = [3, 96], strides = [1, 1]} : vector<3x192xf32> to vector<3x96xf32>
    %605 = vector.extract_strided_slice %594 {offsets = [0, 0], sizes = [3, 32], strides = [1, 1]} : vector<3x96xf32> to vector<3x32xf32>
    %606 = vector.extract_strided_slice %604 {offsets = [0, 0], sizes = [3, 32], strides = [1, 1]} : vector<3x96xf32> to vector<3x32xf32>
    %607 = arith.addf %605, %606 : vector<3x32xf32>
    %608 = arith.negf %607 : vector<3x32xf32>
    %609 = math.exp %608 : vector<3x32xf32>
    %cst_140 = arith.constant 1.000000e+00 : f32
    %610 = vector.broadcast %cst_140 : f32 to vector<3x32xf32>
    %611 = arith.addf %610, %609 : vector<3x32xf32>
    %612 = arith.divf %610, %611 : vector<3x32xf32>
    %613 = vector.extract_strided_slice %594 {offsets = [0, 32], sizes = [3, 32], strides = [1, 1]} : vector<3x96xf32> to vector<3x32xf32>
    %614 = vector.extract_strided_slice %604 {offsets = [0, 32], sizes = [3, 32], strides = [1, 1]} : vector<3x96xf32> to vector<3x32xf32>
    %615 = arith.addf %613, %614 : vector<3x32xf32>
    %616 = arith.negf %615 : vector<3x32xf32>
    %617 = math.exp %616 : vector<3x32xf32>
    %cst_141 = arith.constant 1.000000e+00 : f32
    %618 = vector.broadcast %cst_141 : f32 to vector<3x32xf32>
    %619 = arith.addf %618, %617 : vector<3x32xf32>
    %620 = arith.divf %618, %619 : vector<3x32xf32>
    %621 = vector.extract_strided_slice %594 {offsets = [0, 64], sizes = [3, 32], strides = [1, 1]} : vector<3x96xf32> to vector<3x32xf32>
    %622 = vector.extract_strided_slice %604 {offsets = [0, 64], sizes = [3, 32], strides = [1, 1]} : vector<3x96xf32> to vector<3x32xf32>
    %623 = arith.mulf %612, %622 : vector<3x32xf32>
    %624 = arith.addf %621, %623 : vector<3x32xf32>
    %625 = math.tanh %624 : vector<3x32xf32>
    %cst_142 = arith.constant 1.000000e+00 : f32
    %626 = vector.broadcast %cst_142 : f32 to vector<3x32xf32>
    %627 = arith.subf %626, %620 : vector<3x32xf32>
    %628 = arith.mulf %627, %625 : vector<3x32xf32>
    %629 = arith.mulf %620, %602 : vector<3x32xf32>
    %630 = arith.addf %628, %629 : vector<3x32xf32>
    %631 = vector.extract_strided_slice %601 {offsets = [0, 96], sizes = [3, 96], strides = [1, 1]} : vector<3x192xf32> to vector<3x96xf32>
    %632 = vector.extract_strided_slice %598 {offsets = [0, 0], sizes = [3, 32], strides = [1, 1]} : vector<3x96xf32> to vector<3x32xf32>
    %633 = vector.extract_strided_slice %631 {offsets = [0, 0], sizes = [3, 32], strides = [1, 1]} : vector<3x96xf32> to vector<3x32xf32>
    %634 = arith.addf %632, %633 : vector<3x32xf32>
    %635 = arith.negf %634 : vector<3x32xf32>
    %636 = math.exp %635 : vector<3x32xf32>
    %cst_143 = arith.constant 1.000000e+00 : f32
    %637 = vector.broadcast %cst_143 : f32 to vector<3x32xf32>
    %638 = arith.addf %637, %636 : vector<3x32xf32>
    %639 = arith.divf %637, %638 : vector<3x32xf32>
    %640 = vector.extract_strided_slice %598 {offsets = [0, 32], sizes = [3, 32], strides = [1, 1]} : vector<3x96xf32> to vector<3x32xf32>
    %641 = vector.extract_strided_slice %631 {offsets = [0, 32], sizes = [3, 32], strides = [1, 1]} : vector<3x96xf32> to vector<3x32xf32>
    %642 = arith.addf %640, %641 : vector<3x32xf32>
    %643 = arith.negf %642 : vector<3x32xf32>
    %644 = math.exp %643 : vector<3x32xf32>
    %cst_144 = arith.constant 1.000000e+00 : f32
    %645 = vector.broadcast %cst_144 : f32 to vector<3x32xf32>
    %646 = arith.addf %645, %644 : vector<3x32xf32>
    %647 = arith.divf %645, %646 : vector<3x32xf32>
    %648 = vector.extract_strided_slice %598 {offsets = [0, 64], sizes = [3, 32], strides = [1, 1]} : vector<3x96xf32> to vector<3x32xf32>
    %649 = vector.extract_strided_slice %631 {offsets = [0, 64], sizes = [3, 32], strides = [1, 1]} : vector<3x96xf32> to vector<3x32xf32>
    %650 = arith.mulf %639, %649 : vector<3x32xf32>
    %651 = arith.addf %648, %650 : vector<3x32xf32>
    %652 = math.tanh %651 : vector<3x32xf32>
    %cst_145 = arith.constant 1.000000e+00 : f32
    %653 = vector.broadcast %cst_145 : f32 to vector<3x32xf32>
    %654 = arith.subf %653, %647 : vector<3x32xf32>
    %655 = arith.mulf %654, %652 : vector<3x32xf32>
    %656 = arith.mulf %647, %603 : vector<3x32xf32>
    %657 = arith.addf %655, %656 : vector<3x32xf32>
    %658 = vector.broadcast %590 : i32 to vector<3x1xi32>
    %659 = arith.cmpi slt, %658, %3 : vector<3x1xi32>
    %660 = vector.broadcast %591 : i32 to vector<3x1xi32>
    %661 = arith.cmpi slt, %660, %3 : vector<3x1xi32>
    %cst_146 = arith.constant 0.000000e+00 : f32
    %662 = vector.shape_cast %659 : vector<3x1xi1> to vector<3x1xi1>
    %663 = vector.broadcast %662 : vector<3x1xi1> to vector<3x32xi1>
    %664 = vector.broadcast %cst_146 : f32 to vector<3x32xf32>
    %665 = arith.select %663, %630, %664 : vector<3x32xi1>, vector<3x32xf32>
    %666 = arith.index_cast %c6_i32 : i32 to index
    %c0_147 = arith.constant 0 : index
    %c0_148 = arith.constant 0 : index
    %667 = vector.load %arg6[%666, %c0_147, %c0_148] : memref<8x3x32xf32, #tpu.memory_space<vmem>>, vector<1x3x32xf32>
    %668 = vector.shape_cast %667 : vector<1x3x32xf32> to vector<3x32xf32>
    %669 = vector.shape_cast %665 : vector<3x32xf32> to vector<1x3x32xf32>
    tpu.vector_store %arg6[%666, %c0_147, %c0_148], %669 {strides = array<i32>} : memref<8x3x32xf32, #tpu.memory_space<vmem>>, vector<1x3x32xf32>,
    %cst_149 = arith.constant 0.000000e+00 : f32
    %670 = vector.shape_cast %661 : vector<3x1xi1> to vector<3x1xi1>
    %671 = vector.broadcast %670 : vector<3x1xi1> to vector<3x32xi1>
    %672 = vector.broadcast %cst_149 : f32 to vector<3x32xf32>
    %673 = arith.select %671, %657, %672 : vector<3x32xi1>, vector<3x32xf32>
    %c7_i32_150 = arith.constant 7 : i32
    %674 = arith.subi %c7_i32_150, %c6_i32 : i32
    %675 = arith.index_cast %674 : i32 to index
    %c0_151 = arith.constant 0 : index
    %c0_152 = arith.constant 0 : index
    %676 = vector.load %arg7[%675, %c0_151, %c0_152] : memref<8x3x32xf32, #tpu.memory_space<vmem>>, vector<1x3x32xf32>
    %677 = vector.shape_cast %676 : vector<1x3x32xf32> to vector<3x32xf32>
    %678 = vector.shape_cast %673 : vector<3x32xf32> to vector<1x3x32xf32>
    tpu.vector_store %arg7[%675, %c0_151, %c0_152], %678 {strides = array<i32>} : memref<8x3x32xf32, #tpu.memory_space<vmem>>, vector<1x3x32xf32>,
    %679 = vector.shape_cast %659 : vector<3x1xi1> to vector<3x1xi1>
    %680 = vector.broadcast %679 : vector<3x1xi1> to vector<3x32xi1>
    %681 = arith.select %680, %630, %602 : vector<3x32xi1>, vector<3x32xf32>
    %682 = vector.shape_cast %661 : vector<3x1xi1> to vector<3x1xi1>
    %683 = vector.broadcast %682 : vector<3x1xi1> to vector<3x32xi1>
    %684 = arith.select %683, %657, %603 : vector<3x32xi1>, vector<3x32xf32>
    %685 = tpu.concatenate %681, %684 in 1 : vector<3x32xf32>, vector<3x32xf32> -> vector<3x64xf32>
    %c7_i32_153 = arith.constant 7 : i32
    %c8_i32_154 = arith.constant 8 : i32
    %686 = arith.muli %arg0, %c8_i32_154 : i32
    %687 = arith.addi %686, %c7_i32_153 : i32
    %c7_i32_155 = arith.constant 7 : i32
    %688 = arith.subi %c7_i32_155, %687 : i32
    %689 = arith.index_cast %c7_i32_153 : i32 to index
    %c0_156 = arith.constant 0 : index
    %c0_157 = arith.constant 0 : index
    %690 = vector.load %arg2[%689, %c0_156, %c0_157] : memref<8x3x96xf32, #tpu.memory_space<vmem>>, vector<1x3x96xf32>
    %691 = vector.shape_cast %690 : vector<1x3x96xf32> to vector<3x96xf32>
    %c7_i32_158 = arith.constant 7 : i32
    %692 = arith.subi %c7_i32_158, %c7_i32_153 : i32
    %693 = arith.index_cast %692 : i32 to index
    %c0_159 = arith.constant 0 : index
    %c0_160 = arith.constant 0 : index
    %694 = vector.load %arg3[%693, %c0_159, %c0_160] : memref<8x3x96xf32, #tpu.memory_space<vmem>>, vector<1x3x96xf32>
    %695 = vector.shape_cast %694 : vector<1x3x96xf32> to vector<3x96xf32>
    %cst_161 = arith.constant dense<0.000000e+00> : vector<3x192xf32>
    %696 = tpu.matmul %685, %4, %cst_161 {dimension_numbers = #tpu.dot_dimension_numbers<[1], [0], [0], [1], [0, 0, 1, 1], [], []>} : vector<3x64xf32>, vector<64x192xf32>, vector<3x192xf32> -> vector<3x192xf32>
    %697 = vector.broadcast %5 : vector<1x192xf32> to vector<3x192xf32>
    %698 = arith.addf %696, %697 : vector<3x192xf32>
    %699 = vector.extract_strided_slice %685 {offsets = [0, 0], sizes = [3, 32], strides = [1, 1]} : vector<3x64xf32> to vector<3x32xf32>
    %700 = vector.extract_strided_slice %685 {offsets = [0, 32], sizes = [3, 32], strides = [1, 1]} : vector<3x64xf32> to vector<3x32xf32>
    %701 = vector.extract_strided_slice %698 {offsets = [0, 0], sizes = [3, 96], strides = [1, 1]} : vector<3x192xf32> to vector<3x96xf32>
    %702 = vector.extract_strided_slice %691 {offsets = [0, 0], sizes = [3, 32], strides = [1, 1]} : vector<3x96xf32> to vector<3x32xf32>
    %703 = vector.extract_strided_slice %701 {offsets = [0, 0], sizes = [3, 32], strides = [1, 1]} : vector<3x96xf32> to vector<3x32xf32>
    %704 = arith.addf %702, %703 : vector<3x32xf32>
    %705 = arith.negf %704 : vector<3x32xf32>
    %706 = math.exp %705 : vector<3x32xf32>
    %cst_162 = arith.constant 1.000000e+00 : f32
    %707 = vector.broadcast %cst_162 : f32 to vector<3x32xf32>
    %708 = arith.addf %707, %706 : vector<3x32xf32>
    %709 = arith.divf %707, %708 : vector<3x32xf32>
    %710 = vector.extract_strided_slice %691 {offsets = [0, 32], sizes = [3, 32], strides = [1, 1]} : vector<3x96xf32> to vector<3x32xf32>
    %711 = vector.extract_strided_slice %701 {offsets = [0, 32], sizes = [3, 32], strides = [1, 1]} : vector<3x96xf32> to vector<3x32xf32>
    %712 = arith.addf %710, %711 : vector<3x32xf32>
    %713 = arith.negf %712 : vector<3x32xf32>
    %714 = math.exp %713 : vector<3x32xf32>
    %cst_163 = arith.constant 1.000000e+00 : f32
    %715 = vector.broadcast %cst_163 : f32 to vector<3x32xf32>
    %716 = arith.addf %715, %714 : vector<3x32xf32>
    %717 = arith.divf %715, %716 : vector<3x32xf32>
    %718 = vector.extract_strided_slice %691 {offsets = [0, 64], sizes = [3, 32], strides = [1, 1]} : vector<3x96xf32> to vector<3x32xf32>
    %719 = vector.extract_strided_slice %701 {offsets = [0, 64], sizes = [3, 32], strides = [1, 1]} : vector<3x96xf32> to vector<3x32xf32>
    %720 = arith.mulf %709, %719 : vector<3x32xf32>
    %721 = arith.addf %718, %720 : vector<3x32xf32>
    %722 = math.tanh %721 : vector<3x32xf32>
    %cst_164 = arith.constant 1.000000e+00 : f32
    %723 = vector.broadcast %cst_164 : f32 to vector<3x32xf32>
    %724 = arith.subf %723, %717 : vector<3x32xf32>
    %725 = arith.mulf %724, %722 : vector<3x32xf32>
    %726 = arith.mulf %717, %699 : vector<3x32xf32>
    %727 = arith.addf %725, %726 : vector<3x32xf32>
    %728 = vector.extract_strided_slice %698 {offsets = [0, 96], sizes = [3, 96], strides = [1, 1]} : vector<3x192xf32> to vector<3x96xf32>
    %729 = vector.extract_strided_slice %695 {offsets = [0, 0], sizes = [3, 32], strides = [1, 1]} : vector<3x96xf32> to vector<3x32xf32>
    %730 = vector.extract_strided_slice %728 {offsets = [0, 0], sizes = [3, 32], strides = [1, 1]} : vector<3x96xf32> to vector<3x32xf32>
    %731 = arith.addf %729, %730 : vector<3x32xf32>
    %732 = arith.negf %731 : vector<3x32xf32>
    %733 = math.exp %732 : vector<3x32xf32>
    %cst_165 = arith.constant 1.000000e+00 : f32
    %734 = vector.broadcast %cst_165 : f32 to vector<3x32xf32>
    %735 = arith.addf %734, %733 : vector<3x32xf32>
    %736 = arith.divf %734, %735 : vector<3x32xf32>
    %737 = vector.extract_strided_slice %695 {offsets = [0, 32], sizes = [3, 32], strides = [1, 1]} : vector<3x96xf32> to vector<3x32xf32>
    %738 = vector.extract_strided_slice %728 {offsets = [0, 32], sizes = [3, 32], strides = [1, 1]} : vector<3x96xf32> to vector<3x32xf32>
    %739 = arith.addf %737, %738 : vector<3x32xf32>
    %740 = arith.negf %739 : vector<3x32xf32>
    %741 = math.exp %740 : vector<3x32xf32>
    %cst_166 = arith.constant 1.000000e+00 : f32
    %742 = vector.broadcast %cst_166 : f32 to vector<3x32xf32>
    %743 = arith.addf %742, %741 : vector<3x32xf32>
    %744 = arith.divf %742, %743 : vector<3x32xf32>
    %745 = vector.extract_strided_slice %695 {offsets = [0, 64], sizes = [3, 32], strides = [1, 1]} : vector<3x96xf32> to vector<3x32xf32>
    %746 = vector.extract_strided_slice %728 {offsets = [0, 64], sizes = [3, 32], strides = [1, 1]} : vector<3x96xf32> to vector<3x32xf32>
    %747 = arith.mulf %736, %746 : vector<3x32xf32>
    %748 = arith.addf %745, %747 : vector<3x32xf32>
    %749 = math.tanh %748 : vector<3x32xf32>
    %cst_167 = arith.constant 1.000000e+00 : f32
    %750 = vector.broadcast %cst_167 : f32 to vector<3x32xf32>
    %751 = arith.subf %750, %744 : vector<3x32xf32>
    %752 = arith.mulf %751, %749 : vector<3x32xf32>
    %753 = arith.mulf %744, %700 : vector<3x32xf32>
    %754 = arith.addf %752, %753 : vector<3x32xf32>
    %755 = vector.broadcast %687 : i32 to vector<3x1xi32>
    %756 = arith.cmpi slt, %755, %3 : vector<3x1xi32>
    %757 = vector.broadcast %688 : i32 to vector<3x1xi32>
    %758 = arith.cmpi slt, %757, %3 : vector<3x1xi32>
    %cst_168 = arith.constant 0.000000e+00 : f32
    %759 = vector.shape_cast %756 : vector<3x1xi1> to vector<3x1xi1>
    %760 = vector.broadcast %759 : vector<3x1xi1> to vector<3x32xi1>
    %761 = vector.broadcast %cst_168 : f32 to vector<3x32xf32>
    %762 = arith.select %760, %727, %761 : vector<3x32xi1>, vector<3x32xf32>
    %763 = arith.index_cast %c7_i32_153 : i32 to index
    %c0_169 = arith.constant 0 : index
    %c0_170 = arith.constant 0 : index
    %764 = vector.load %arg6[%763, %c0_169, %c0_170] : memref<8x3x32xf32, #tpu.memory_space<vmem>>, vector<1x3x32xf32>
    %765 = vector.shape_cast %764 : vector<1x3x32xf32> to vector<3x32xf32>
    %766 = vector.shape_cast %762 : vector<3x32xf32> to vector<1x3x32xf32>
    tpu.vector_store %arg6[%763, %c0_169, %c0_170], %766 {strides = array<i32>} : memref<8x3x32xf32, #tpu.memory_space<vmem>>, vector<1x3x32xf32>,
    %cst_171 = arith.constant 0.000000e+00 : f32
    %767 = vector.shape_cast %758 : vector<3x1xi1> to vector<3x1xi1>
    %768 = vector.broadcast %767 : vector<3x1xi1> to vector<3x32xi1>
    %769 = vector.broadcast %cst_171 : f32 to vector<3x32xf32>
    %770 = arith.select %768, %754, %769 : vector<3x32xi1>, vector<3x32xf32>
    %c7_i32_172 = arith.constant 7 : i32
    %771 = arith.subi %c7_i32_172, %c7_i32_153 : i32
    %772 = arith.index_cast %771 : i32 to index
    %c0_173 = arith.constant 0 : index
    %c0_174 = arith.constant 0 : index
    %773 = vector.load %arg7[%772, %c0_173, %c0_174] : memref<8x3x32xf32, #tpu.memory_space<vmem>>, vector<1x3x32xf32>
    %774 = vector.shape_cast %773 : vector<1x3x32xf32> to vector<3x32xf32>
    %775 = vector.shape_cast %770 : vector<3x32xf32> to vector<1x3x32xf32>
    tpu.vector_store %arg7[%772, %c0_173, %c0_174], %775 {strides = array<i32>} : memref<8x3x32xf32, #tpu.memory_space<vmem>>, vector<1x3x32xf32>,
    %776 = vector.shape_cast %756 : vector<3x1xi1> to vector<3x1xi1>
    %777 = vector.broadcast %776 : vector<3x1xi1> to vector<3x32xi1>
    %778 = arith.select %777, %727, %699 : vector<3x32xi1>, vector<3x32xf32>
    %779 = vector.shape_cast %758 : vector<3x1xi1> to vector<3x1xi1>
    %780 = vector.broadcast %779 : vector<3x1xi1> to vector<3x32xi1>
    %781 = arith.select %780, %754, %700 : vector<3x32xi1>, vector<3x32xf32>
    %782 = tpu.concatenate %778, %781 in 1 : vector<3x32xf32>, vector<3x32xf32> -> vector<3x64xf32>
    %c8_i32_175 = arith.constant 8 : i32
    %c0_176 = arith.constant 0 : index
    %c0_177 = arith.constant 0 : index
    %783 = vector.load %arg8[%c0_176, %c0_177] : memref<3x64xf32, #tpu.memory_space<vmem>>, vector<3x64xf32>
    tpu.vector_store %arg8[%c0_176, %c0_177], %782 {strides = array<i32>} : memref<3x64xf32, #tpu.memory_space<vmem>>, vector<3x64xf32>,
    return
  }
  func.func @transform_0(%arg0: i32) -> (i32, i32) {
    %c0_i32 = arith.constant 0 : i32
    %c0_i32_0 = arith.constant 0 : i32
    %c0_i32_1 = arith.constant 0 : i32
    return %c0_i32, %c0_i32_0 : i32, i32
  }
  func.func @transform_1(%arg0: i32) -> (i32, i32, i32) {
    %c0_i32 = arith.constant 0 : i32
    %c0_i32_0 = arith.constant 0 : i32
    %c0_i32_1 = arith.constant 0 : i32
    return %arg0, %c0_i32, %c0_i32_0 : i32, i32, i32
  }
  func.func @transform_2(%arg0: i32) -> (i32, i32, i32) {
    %c0_i32 = arith.constant 0 : i32
    %0 = arith.subi %c0_i32, %arg0 : i32
    %c0_i32_0 = arith.constant 0 : i32
    %c0_i32_1 = arith.constant 0 : i32
    %c0_i32_2 = arith.constant 0 : i32
    return %0, %c0_i32_0, %c0_i32_1 : i32, i32, i32
  }
  func.func @transform_3(%arg0: i32) -> (i32, i32) {
    %c0_i32 = arith.constant 0 : i32
    %c0_i32_0 = arith.constant 0 : i32
    %c0_i32_1 = arith.constant 0 : i32
    return %c0_i32, %c0_i32_0 : i32, i32
  }
  func.func @transform_4(%arg0: i32) -> (i32, i32) {
    %c0_i32 = arith.constant 0 : i32
    %c0_i32_0 = arith.constant 0 : i32
    %c0_i32_1 = arith.constant 0 : i32
    return %c0_i32, %c0_i32_0 : i32, i32
  }
  func.func @transform_5(%arg0: i32) -> (i32, i32, i32) {
    %c0_i32 = arith.constant 0 : i32
    %c0_i32_0 = arith.constant 0 : i32
    %c0_i32_1 = arith.constant 0 : i32
    return %arg0, %c0_i32, %c0_i32_0 : i32, i32, i32
  }
  func.func @transform_6(%arg0: i32) -> (i32, i32, i32) {
    %c0_i32 = arith.constant 0 : i32
    %0 = arith.subi %c0_i32, %arg0 : i32
    %c0_i32_0 = arith.constant 0 : i32
    %c0_i32_1 = arith.constant 0 : i32
    %c0_i32_2 = arith.constant 0 : i32
    return %0, %c0_i32_0, %c0_i32_1 : i32, i32, i32
  }
  func.func @transform_7(%arg0: i32) -> (i32, i32) {
    %c0_i32 = arith.constant 0 : i32
    %c0_i32_0 = arith.constant 0 : i32
    %c0_i32_1 = arith.constant 0 : i32
    return %c0_i32, %c0_i32_0 : i32, i32
  }
}

</mosaic_0001>

<bundles_post_ra>
// kernel: tpu_custom_call.1
= control target key start
LH: loop header
LB: loop body
LE: loop exit
PB: predicated region body
PF: predicated region fallthrough
CT: control target
= control target key end

     0   :  { %13 = vsyncpa [#allocation3], 0  ;;  %s2505_s0 = inlined_call_operand.vmem [shape: s32[3,1], index: 0, kind: input, shape index: {}]   ;;  %s2506_s1 = inlined_call_operand.vmem [shape: f32[8,3,96], index: 1, kind: input, shape index: {}]   ;;  %s2507_s2 = inlined_call_operand.vmem [shape: f32[8,3,96], index: 2, kind: input, shape index: {}]   ;;  %s2508_s3 = inlined_call_operand.hbm [shape: f32[64,192], index: 3, kind: input, shape index: {}]   ;;  %s2509_s4 = inlined_call_operand.vmem [shape: f32[1,192], index: 4, kind: input, shape index: {}]   ;;  %s2510_s5 = inlined_call_operand.vmem [shape: f32[8,3,32], index: 5, kind: output, shape index: {0}]   ;;  %s2511_s6 = inlined_call_operand.vmem [shape: f32[8,3,32], index: 6, kind: output, shape index: {1}]   ;;  %s2512_s7 = inlined_call_operand.hbm [shape: f32[3,64], index: 7, kind: output, shape index: {2}]  }
   0x1   :  { %14 = vsyncpa [#allocation4], 0  ;;  %s1900_s24 = smov [#allocation2]  }
   0x2   :  { %s34_s25 = sshll.u32 %s1900_s24, 4  ;;  %s35_s25 = int_to_ptr.vmem [resolvable:$true] %s34_s25 }
   0x3   :  { %s1864_s26 = scalar_lea.vmem %s35_s25, 2048  ;;  %p1869_p1 = scmp.lt.s32.totalorder %s35_s25, %s35_s25 }
   0x4   :  { %p1865_p0 = scmp.ne.s32.totalorder %s35_s25, %s1864_s26  ;;  %p1870_p2 = scmp.lt.s32.totalorder %s1864_s26, %s1864_s26 }
   0x6   :  { %p1871_p3 = por %p1870_p2, %p1869_p1 }
   0x8   :  { %p1872_p4 = pnand %p1871_p3, %p1865_p0 }
   0xa   :  { %1875 = shalt.err (!%p1872_p4)
}
   0xb   :  { %s1901_s27 = smov 256   ;;  %s1902_s28 = smov 16  }
   0xc   :  { %40 = dma.hbm_to_vmem [thread:$0]  %s2508_s3, 2048, %s35_s25, [#allocation3], %s1901_s27, %s1901_s27, %s1902_s28  }
   0xd   :  { %1896 = dma.done.wait [#allocation3], 2048  }
   0xe   :  { %1897 = vsyncadd [#allocation3], 4294965248  ;;  %vm78_vm0 = vcmask 518144   ;;  %v1903_v0 = vmov 0.0   ;;  %v1956_v1 = vld [vmem:[#allocation2 + $0x78] sm:$0xff]  ;;  %v1958_v2 = vld [vmem:[#allocation2 + $0x70] sm:$0xff]  ;;  %v105_v18 = vlaneseq }
   0xf   :  { %183 = vmatprep.mubr.f32.mxu0 %v1903_v0  ;;  %79 = vst.msk [vmem:[#allocation5] sm:$0x7] %vm78_vm0, %v1903_v0  ;;  %367 = vmatprep.mubr.f32.mxu1 %v1903_v0  ;;  %v1960_v3 = vld [vmem:[#allocation2 + $0x68] sm:$0xff]  ;;  %v1963_v4 = vld [vmem:[#allocation2 + $0x60] sm:$0xff]  ;;  %v1967_v5 = vld [vmem:[#allocation2 + $0x58] sm:$0xff]  ;;  %vm115_vm1 = vcmask 523264  }
  0x10   :  { %135 = vmatprep.subr.mxu0 %v1956_v1  ;;  %319 = vmatprep.subr.mxu1 %v1956_v1  ;;  %v1971_v6 = vld [vmem:[#allocation2 + $0x50] sm:$0xff]  ;;  %v1975_v7 = vld [vmem:[#allocation2 + $0x48] sm:$0xff]  ;;  %v1979_v8 = vld [vmem:[#allocation2 + $0x40] sm:$0xff]  ;;  %v106_v19 = vshrl.u32 %v105_v18, 7  ;;  %v1904_v23 = vmov 0   ;;  %s1905_s9 = smov 64  }
  0x11   :  { %136 = vmatpush1.msra.mxu0 %v1958_v2  ;;  %320 = vmatpush1.msra.mxu1 %v1958_v2  ;;  %v1983_v9 = vld [vmem:[#allocation2 + $0x38] sm:$0xff]  ;;  %v1987_v10 = vld [vmem:[#allocation2 + $0x30] sm:$0xff]  ;;  %v1991_v11 = vld [vmem:[#allocation2 + $0x28] sm:$0xff]  ;;  %s1907_s10 = smov 32   ;;  %vm292_vm6 = vcmask 261120  }
  0x12   :  { %137 = vmatprep.subr.mxu0 %v1960_v3  ;;  %321 = vmatprep.subr.mxu1 %v1960_v3  ;;  %v1995_v12 = vld [vmem:[#allocation2 + $0x20] sm:$0xff]  ;;  %v1999_v13 = vld [vmem:[#allocation2 + $0x18] sm:$0xff]  ;;  %v2003_v14 = vld [vmem:[#allocation2 + $0x10] sm:$0xff]  ;;  %v107_v20 = vsub.s32 0, %v106_v19  ;;  %v111_v22 = vsub.s32 1, %v106_v19 }
  0x13   :  { %138 = vmatpush1.msra.mxu0 %v1963_v4  ;;  %322 = vmatpush1.msra.mxu1 %v1963_v4  ;;  %v2007_v15 = vld [vmem:[#allocation2 + $0x8] sm:$0xff]  ;;  %v2011_v16 = vld [vmem:[#allocation2] sm:$0xff]  ;;  %v1626_v39 = vld [vmem:[%s2507_s2 + $0x1c] sm:$0x7] }
  0x14   :  { %139 = vmatprep.subr.mxu0 %v1967_v5  ;;  %323 = vmatprep.subr.mxu1 %v1967_v5  ;;  %v97_v21 = vld [vmem:[%s2509_s4] sm:$0x3]  ;;  %s1906_s4 = smov 96  }
  0x15   :  { %140 = vmatpush1.msra.mxu0 %v1971_v6  ;;  %324 = vmatpush1.msra.mxu1 %v1971_v6  ;;  %v2048_v24 = vrot.slane %v97_v21, %v107_v20  ;;  %v2050_v25 = vrot.slane %v97_v21, %v111_v22  ;;  %v101_v30 = vld [vmem:[%s2506_s1] sm:$0x7] }
  0x16   :  { %141 = vmatprep.subr.mxu0 %v1975_v7  ;;  %325 = vmatprep.subr.mxu1 %v1975_v7  ;;  %v2015_v17 = vld [vmem:[#allocation5] sm:$0x7] }
  0x17   :  { %142 = vmatpush1.msra.mxu0 %v1979_v8  ;;  %326 = vmatpush1.msra.mxu1 %v1979_v8  ;;  %v2063_v35 = vld [vmem:[%s2505_s0] sm:$0x7] }
  0x18   :  { %143 = vmatprep.subr.mxu0 %v1983_v9  ;;  %327 = vmatprep.subr.mxu1 %v1983_v9  ;;  %vm1631_vm2 = vcmp.gt.s32.totalorder %v2063_v35, 0  ;;  %vm1632_vm3 = vcmp.gt.s32.totalorder %v2063_v35, 7  ;;  %vm1640_vm7 = vcmp.gt.s32.totalorder %v2063_v35, 1  ;;  %vm1641_vm8 = vcmp.gt.s32.totalorder %v2063_v35, 6 }
  0x19   :  { %144 = vmatpush1.msra.mxu0 %v1987_v10  ;;  %328 = vmatpush1.msra.mxu1 %v1987_v10  ;;  %v2071_v41 = vsel %vm1631_vm2, 1, %v1904_v23  ;;  %v2078_v44 = vsel %vm1632_vm3, 1, %v1904_v23  ;;  %vm1650_vm11 = vcmp.gt.s32.totalorder %v2063_v35, 2  ;;  %vm1651_vm12 = vcmp.gt.s32.totalorder %v2063_v35, 5 }
  0x1a   :  { %145 = vmatprep.subr.mxu0 %v1991_v11  ;;  %329 = vmatprep.subr.mxu1 %v1991_v11  ;;  %vm1660_vm15 = vcmp.gt.s32.totalorder %v2063_v35, 3  ;;  %vm1661_vm2 = vcmp.gt.s32.totalorder %v2063_v35, 4 }
  0x1b   :  { %146 = vmatpush1.msra.mxu0 %v1995_v12  ;;  %330 = vmatpush1.msra.mxu1 %v1995_v12 }
  0x1c   :  { %147 = vmatprep.subr.mxu0 %v1999_v13  ;;  %331 = vmatprep.subr.mxu1 %v1999_v13 }
  0x1d   :  { %148 = vmatpush1.msra.mxu0 %v2003_v14  ;;  %332 = vmatpush1.msra.mxu1 %v2003_v14 }
  0x1e   :  { %149 = vmatprep.subr.mxu0 %v2007_v15  ;;  %333 = vmatprep.subr.mxu1 %v2007_v15 }
  0x1f   :  { %150 = vmatpush1.msra.mxu0 %v2011_v16  ;;  %334 = vmatpush1.msra.mxu1 %v2011_v16 }
  0x20   :  { %1627 = vmatmul.mubr.msk.f32.vlgmr.msra.gmra.mxu0 %vm115_vm1, %v2015_v17  ;;  %502 = vmatprep.subr.mxu0 %v1956_v1 }
  0x21   :  { %503 = vmatpush1.msra.mxu0 %v1958_v2  ;;  %550 = vmatprep.mubr.f32.mxu0 %v1903_v0 }
  0x22   :  { %504 = vmatprep.subr.mxu0 %v1960_v3  ;;  %685 = vmatprep.subr.mxu1 %v1956_v1 }
  0x23   :  { %505 = vmatpush1.msra.mxu0 %v1963_v4  ;;  %1711 = vset.pattern.permute.xlu1 %v1904_v23 }
  0x24   :  { %506 = vmatprep.subr.mxu0 %v1967_v5  ;;  %1712 = vset.pattern.permute.xlu0 %v1904_v23 }
  0x25   :  { %507 = vmatpush1.msra.mxu0 %v1971_v6 }
  0x26   :  { %508 = vmatprep.subr.mxu0 %v1975_v7 }
  0x27   :  { %509 = vmatpush1.msra.mxu0 %v1979_v8 }
  0x28   :  { %510 = vmatprep.subr.mxu0 %v1983_v9 }
  0x29   :  { %511 = vmatpush1.msra.mxu0 %v1987_v10 }
  0x2a   :  { %512 = vmatprep.subr.mxu0 %v1991_v11 }
  0x2b   :  { %513 = vmatpush1.msra.mxu0 %v1995_v12 }
  0x2c   :  { %514 = vmatprep.subr.mxu0 %v1999_v13 }
  0x2d   :  { %515 = vmatpush1.msra.mxu0 %v2003_v14 }
  0x2e   :  { %516 = vmatprep.subr.mxu0 %v2007_v15 }
  0x2f   :  { %517 = vmatpush1.msra.mxu0 %v2011_v16 }
  0x30   :  { %868 = vmatprep.subr.mxu0 %v1956_v1 }
  0xe0   :  { %v185_v26 = vpop.f32.mrf.mxu0 }
  0xe1   :  { %v186_v27 = vadd.f32 %v185_v26, %v2048_v24 }
  0xe2   :  { %v187_v28 = vpop.f32.mrf.mxu0 }
  0xe3   :  { %v188_v29 = vadd.f32 %v187_v28, %v2050_v25  ;;  %198 = vrot.lane.b32.xlu0 %v186_v27, %s1905_s9  ;;  %v190_v31 = vadd.f32 %v186_v27, %v101_v30 }
  0xe5   :  { %240 = vrot.lane.b32.xlu1 %v188_v29, %s1906_s4  ;;  %v1628_v32 = vmul.f32 -1.442695, %v190_v31 }
  0xe7   :  { %219 = vrot.lane.b32.xlu0 %v186_v27, %s1907_s10  ;;  %1713 = vpow2.f32 %v1628_v32 }
  0xf4   :  { %v1714_v33 = vpop.eup %1713 }
  0xf5   :  { %v194_v34 = vadd.f32 1.0, %v1714_v33 }
  0xf7   :  { %1715 = vrcp.f32 %v194_v34 }
 0x104   :  { %v1716_v36 = vpop.eup %1715 }
 0x105   :  { %v208_v58 = vsub.f32 1.0, %v1716_v36 }
 0x155   :  { %v199_v37 = vpop.permute.xlu0 %198 }
 0x156   :  { %v201_v38 = vmul.f32 %v1716_v36, %v199_v37 }
 0x157   :  { %v241_v48 = vpop.permute.xlu1 %240 }
 0x158   :  { %203 = vrot.lane.b32.xlu1 %v201_v38, %s1905_s9 }
 0x159   :  { %v220_v40 = vpop.permute.xlu0 %219 }
 0x15a   :  { %v222_v42 = vadd.f32 %v1626_v39, %v220_v40 }
 0x15c   :  { %v1629_v43 = vmul.f32 -1.442695, %v222_v42  ;;  %264 = vperm.xlu1 %1711, %v2071_v41  }
 0x15e   :  { %1717 = vpow2.f32 %v1629_v43  ;;  %v1634_v43 = vld [vmem:[%s2506_s1 + $0x4] sm:$0x7] }
 0x160   :  { %214 = vrot.lane.b32.xlu1 %v2015_v17, %s1907_s10 }
 0x164   :  { %276 = vperm.xlu1 %1711, %v2078_v44  }
 0x16b   :  { %v1718_v45 = vpop.eup %1717 }
 0x16c   :  { %v226_v46 = vadd.f32 1.0, %v1718_v45 }
 0x16e   :  { %1719 = vrcp.f32 %v226_v46 }
 0x17b   :  { %v1720_v47 = vpop.eup %1719 }
 0x17c   :  { %v243_v49 = vmul.f32 %v1720_v47, %v241_v48 }
 0x17e   :  { %245 = vrot.lane.b32.xlu0 %v243_v49, %s1905_s9  ;;  %v1635_v49 = vld [vmem:[%s2507_s2 + $0x18] sm:$0x7] }
 0x1ca   :  { %v204_v50 = vpop.permute.xlu1 %203 }
 0x1cb   :  { %v206_v51 = vadd.f32 %v204_v50, %v101_v30 }
 0x1cd   :  { %1721 = vtanh.f32 %v206_v51 }
 0x1d7   :  { %v265_v56 = vpop.permute.xlu1 %264 }
 0x1d8   :  { %vm266_vm4 = vcmp.eq.s32.totalorder %v265_v56, 1  ;;  %v2128_v56 = vsel %vm1640_vm7, 1, %v1904_v23 }
 0x1da   :  { %v1722_v52 = vpop.eup %1721 }
 0x1db   :  { %210 = vrot.lane.b32.xlu0 %v1722_v52, %s1906_s4  ;;  %v215_v57 = vpop.permute.xlu1 %214 }
 0x1dc   :  { %v217_v60 = vmul.f32 %v1716_v36, %v215_v57 }
 0x1df   :  { %230 = vrot.lane.b32.xlu0 %v188_v29, %s1907_s10  ;;  %v277_v30 = vpop.permute.xlu1 %276 }
 0x1e0   :  { %vm278_vm5 = vcmp.eq.s32.totalorder %v277_v30, 1 }
 0x1f0   :  { %v246_v53 = vpop.permute.xlu0 %245 }
 0x1f1   :  { %v248_v54 = vadd.f32 %v1626_v39, %v246_v53 }
 0x1f3   :  { %1723 = vtanh.f32 %v248_v54 }
 0x200   :  { %v1724_v55 = vpop.eup %1723 }
 0x201   :  { %252 = vrot.lane.b32.xlu0 %v1724_v55, %s1906_s4 }
 0x24d   :  { %v211_v59 = vpop.permute.xlu0 %210 }
 0x24e   :  { %v213_v61 = vmul.f32 %v211_v59, %v208_v58 }
 0x250   :  { %v218_v62 = vadd.f32 %v217_v60, %v213_v61 }
 0x251   :  { %v231_v63 = vpop.permute.xlu0 %230 }
 0x252   :  { %v233_v18 = vadd.f32 %v1626_v39, %v231_v63  ;;  %v286_v19 = vsel %vm266_vm4, %v218_v62, %v215_v57  ;;  %v2085_v20 = vsel %vm266_vm4, %v218_v62, 0.0  ;;  %v2135_v57 = vsel %vm1641_vm8, 1, %v1904_v23 }
 0x253   :  { %289 = vrot.lane.b32.xlu1 %v286_v19, %s1906_s4 }
 0x254   :  { %v1630_v21 = vmul.f32 -1.442695, %v233_v18 }
 0x256   :  { %1725 = vpow2.f32 %v1630_v21 }
 0x263   :  { %v1726_v22 = vpop.eup %1725 }
 0x264   :  { %v237_v26 = vadd.f32 1.0, %v1726_v22 }
 0x266   :  { %1727 = vrcp.f32 %v237_v26 }
 0x273   :  { %v1728_v27 = vpop.eup %1727  ;;  %v253_v29 = vpop.permute.xlu0 %252 }
 0x274   :  { %v250_v28 = vsub.f32 1.0, %v1728_v27  ;;  %v256_v31 = vmul.f32 %v1728_v27, %v2015_v17 }
 0x276   :  { %v255_v32 = vmul.f32 %v253_v29, %v250_v28 }
 0x278   :  { %v257_v33 = vadd.f32 %v256_v31, %v255_v32 }
 0x27a   :  { %v2089_v34 = vsel %vm278_vm5, %v257_v33, 0.0  ;;  %v287_v36 = vsel %vm278_vm5, %v257_v33, %v2015_v17 }
 0x2c5   :  { %v290_v37 = vpop.permute.xlu1 %289 }
 0x2c6   :  { %v2093_v38 = vsel %vm292_vm6, %v290_v37, %v287_v36 }
 0x2c7   :  { %1636 = vmatmul.mubr.msk.f32.vlgmr.msra.gmra.mxu1 %vm115_vm1, %v2093_v38 }
 0x2c8   :  { %686 = vmatpush1.msra.mxu1 %v1958_v2  ;;  %733 = vmatprep.mubr.f32.mxu1 %v1903_v0 }
 0x2c9   :  { %687 = vmatprep.subr.mxu1 %v1960_v3 }
 0x2ca   :  { %688 = vmatpush1.msra.mxu1 %v1963_v4 }
 0x2cb   :  { %689 = vmatprep.subr.mxu1 %v1967_v5 }
 0x2cc   :  { %690 = vmatpush1.msra.mxu1 %v1971_v6 }
 0x2cd   :  { %691 = vmatprep.subr.mxu1 %v1975_v7 }
 0x2ce   :  { %692 = vmatpush1.msra.mxu1 %v1979_v8 }
 0x2cf   :  { %693 = vmatprep.subr.mxu1 %v1983_v9 }
 0x2d0   :  { %694 = vmatpush1.msra.mxu1 %v1987_v10 }
 0x2d1   :  { %695 = vmatprep.subr.mxu1 %v1991_v11 }
 0x2d2   :  { %696 = vmatpush1.msra.mxu1 %v1995_v12 }
 0x2d3   :  { %697 = vmatprep.subr.mxu1 %v1999_v13 }
 0x2d4   :  { %698 = vmatpush1.msra.mxu1 %v2003_v14 }
 0x2d5   :  { %699 = vmatprep.subr.mxu1 %v2007_v15 }
 0x2d6   :  { %700 = vmatpush1.msra.mxu1 %v2011_v16 }
 0x2d7   :  { %1051 = vmatprep.subr.mxu1 %v1956_v1 }
 0x387   :  { %v369_v17 = vpop.f32.mrf.mxu1 }
 0x388   :  { %v370_v39 = vadd.f32 %v369_v17, %v2048_v24 }
 0x389   :  { %v371_v40 = vpop.f32.mrf.mxu1 }
 0x38a   :  { %403 = vrot.lane.b32.xlu1 %v370_v39, %s1907_s10  ;;  %382 = vrot.lane.b32.xlu0 %v370_v39, %s1905_s9  ;;  %v372_v42 = vadd.f32 %v371_v40, %v2050_v25  ;;  %v374_v45 = vadd.f32 %v1634_v43, %v370_v39 }
 0x38c   :  { %v1637_v46 = vmul.f32 -1.442695, %v374_v45 }
 0x38e   :  { %424 = vrot.lane.b32.xlu0 %v372_v42, %s1906_s4  ;;  %1729 = vpow2.f32 %v1637_v46 }
 0x39b   :  { %v1730_v47 = vpop.eup %1729 }
 0x39c   :  { %v378_v48 = vadd.f32 1.0, %v1730_v47 }
 0x39e   :  { %1731 = vrcp.f32 %v378_v48 }
 0x3ab   :  { %v1732_v50 = vpop.eup %1731 }
 0x3ac   :  { %v392_v29 = vsub.f32 1.0, %v1732_v50 }
 0x3fc   :  { %v404_v51 = vpop.permute.xlu1 %403  ;;  %v383_v52 = vpop.permute.xlu0 %382 }
 0x3fd   :  { %v406_v53 = vadd.f32 %v1635_v49, %v404_v51  ;;  %v385_v54 = vmul.f32 %v1732_v50, %v383_v52 }
 0x3ff   :  { %v1638_v55 = vmul.f32 -1.442695, %v406_v53  ;;  %387 = vrot.lane.b32.xlu1 %v385_v54, %s1905_s9 }
 0x400   :  { %v425_v61 = vpop.permute.xlu0 %424 }
 0x401   :  { %1733 = vpow2.f32 %v1638_v55 }
 0x403   :  { %448 = vperm.xlu1 %1711, %v2128_v56  }
 0x407   :  { %398 = vrot.lane.b32.xlu1 %v2093_v38, %s1907_s10 }
 0x40b   :  { %460 = vperm.xlu1 %1711, %v2135_v57  }
 0x40e   :  { %v1734_v58 = vpop.eup %1733 }
 0x40f   :  { %v410_v59 = vadd.f32 1.0, %v1734_v58 }
 0x411   :  { %1735 = vrcp.f32 %v410_v59 }
 0x41e   :  { %v1736_v60 = vpop.eup %1735 }
 0x41f   :  { %v427_v62 = vmul.f32 %v1736_v60, %v425_v61  ;;  %v1644_v61 = vld [vmem:[%s2506_s1 + $0x8] sm:$0x7] }
 0x421   :  { %429 = vrot.lane.b32.xlu0 %v427_v62, %s1905_s9 }
 0x471   :  { %v388_v63 = vpop.permute.xlu1 %387 }
 0x472   :  { %v390_v18 = vadd.f32 %v1634_v43, %v388_v63 }
 0x474   :  { %1737 = vtanh.f32 %v390_v18 }
 0x47e   :  { %v449_v27 = vpop.permute.xlu1 %448 }
 0x47f   :  { %vm450_vm9 = vcmp.eq.s32.totalorder %v449_v27, 1 }
 0x481   :  { %v1738_v19 = vpop.eup %1737 }
 0x482   :  { %394 = vrot.lane.b32.xlu0 %v1738_v19, %s1906_s4  ;;  %v399_v28 = vpop.permute.xlu1 %398 }
 0x483   :  { %v401_v31 = vmul.f32 %v1732_v50, %v399_v28 }
 0x486   :  { %414 = vrot.lane.b32.xlu0 %v372_v42, %s1907_s10  ;;  %v461_v48 = vpop.permute.xlu1 %460 }
 0x487   :  { %vm462_vm10 = vcmp.eq.s32.totalorder %v461_v48, 1 }
 0x493   :  { %v430_v21 = vpop.permute.xlu0 %429 }
 0x494   :  { %v432_v22 = vadd.f32 %v1635_v49, %v430_v21  ;;  %v1645_v21 = vld [vmem:[%s2507_s2 + $0x14] sm:$0x7] }
 0x496   :  { %1739 = vtanh.f32 %v432_v22 }
 0x4a3   :  { %v1740_v26 = vpop.eup %1739 }
 0x4a4   :  { %436 = vrot.lane.b32.xlu0 %v1740_v26, %s1906_s4 }
 0x4f4   :  { %v395_v30 = vpop.permute.xlu0 %394 }
 0x4f5   :  { %v397_v32 = vmul.f32 %v395_v30, %v392_v29 }
 0x4f7   :  { %v402_v33 = vadd.f32 %v401_v31, %v397_v32  ;;  %v2185_v31 = vsel %vm1650_vm11, 1, %v1904_v23  ;;  %v2192_v32 = vsel %vm1651_vm12, 1, %v1904_v23 }
 0x4f8   :  { %v415_v36 = vpop.permute.xlu0 %414 }
 0x4f9   :  { %v417_v37 = vadd.f32 %v1635_v49, %v415_v36  ;;  %v470_v17 = vsel %vm450_vm9, %v402_v33, %v399_v28  ;;  %v2142_v39 = vsel %vm450_vm9, %v402_v33, 0.0 }
 0x4fa   :  { %473 = vrot.lane.b32.xlu1 %v470_v17, %s1906_s4 }
 0x4fb   :  { %v1639_v40 = vmul.f32 -1.442695, %v417_v37 }
 0x4fd   :  { %1741 = vpow2.f32 %v1639_v40 }
 0x50a   :  { %v1742_v42 = vpop.eup %1741 }
 0x50b   :  { %v421_v43 = vadd.f32 1.0, %v1742_v42 }
 0x50d   :  { %1743 = vrcp.f32 %v421_v43 }
 0x516   :  { %v437_v47 = vpop.permute.xlu0 %436 }
 0x51a   :  { %v1744_v45 = vpop.eup %1743 }
 0x51b   :  { %v434_v46 = vsub.f32 1.0, %v1744_v45  ;;  %v440_v50 = vmul.f32 %v1744_v45, %v2093_v38 }
 0x51d   :  { %v439_v51 = vmul.f32 %v437_v47, %v434_v46 }
 0x51f   :  { %v441_v52 = vadd.f32 %v440_v50, %v439_v51 }
 0x521   :  { %v2146_v49 = vsel %vm462_vm10, %v441_v52, 0.0  ;;  %v471_v53 = vsel %vm462_vm10, %v441_v52, %v2093_v38 }
 0x56c   :  { %v474_v54 = vpop.permute.xlu1 %473 }
 0x56d   :  { %v2150_v55 = vsel %vm292_vm6, %v474_v54, %v471_v53 }
 0x56e   :  { %1646 = vmatmul.mubr.msk.f32.vlgmr.msra.gmra.mxu0 %vm115_vm1, %v2150_v55 }
 0x56f   :  { %869 = vmatpush1.msra.mxu0 %v1958_v2  ;;  %916 = vmatprep.mubr.f32.mxu0 %v1903_v0 }
 0x570   :  { %870 = vmatprep.subr.mxu0 %v1960_v3 }
 0x571   :  { %871 = vmatpush1.msra.mxu0 %v1963_v4 }
 0x572   :  { %872 = vmatprep.subr.mxu0 %v1967_v5 }
 0x573   :  { %873 = vmatpush1.msra.mxu0 %v1971_v6 }
 0x574   :  { %874 = vmatprep.subr.mxu0 %v1975_v7 }
 0x575   :  { %875 = vmatpush1.msra.mxu0 %v1979_v8 }
 0x576   :  { %876 = vmatprep.subr.mxu0 %v1983_v9 }
 0x577   :  { %877 = vmatpush1.msra.mxu0 %v1987_v10 }
 0x578   :  { %878 = vmatprep.subr.mxu0 %v1991_v11 }
 0x579   :  { %879 = vmatpush1.msra.mxu0 %v1995_v12 }
 0x57a   :  { %880 = vmatprep.subr.mxu0 %v1999_v13 }
 0x57b   :  { %881 = vmatpush1.msra.mxu0 %v2003_v14 }
 0x57c   :  { %882 = vmatprep.subr.mxu0 %v2007_v15 }
 0x57d   :  { %883 = vmatpush1.msra.mxu0 %v2011_v16 }
 0x57e   :  { %1234 = vmatprep.subr.mxu0 %v1956_v1 }
 0x62e   :  { %v552_v38 = vpop.f32.mrf.mxu0 }
 0x62f   :  { %v553_v58 = vadd.f32 %v552_v38, %v2048_v24 }
 0x630   :  { %v554_v59 = vpop.f32.mrf.mxu0 }
 0x631   :  { %586 = vrot.lane.b32.xlu1 %v553_v58, %s1907_s10  ;;  %565 = vrot.lane.b32.xlu0 %v553_v58, %s1905_s9  ;;  %v555_v60 = vadd.f32 %v554_v59, %v2050_v25  ;;  %v557_v62 = vadd.f32 %v1644_v61, %v553_v58 }
 0x633   :  { %v1647_v63 = vmul.f32 -1.442695, %v557_v62 }
 0x635   :  { %607 = vrot.lane.b32.xlu0 %v555_v60, %s1906_s4  ;;  %1745 = vpow2.f32 %v1647_v63 }
 0x642   :  { %v1746_v18 = vpop.eup %1745 }
 0x643   :  { %v561_v19 = vadd.f32 1.0, %v1746_v18 }
 0x645   :  { %1747 = vrcp.f32 %v561_v19 }
 0x652   :  { %v1748_v22 = vpop.eup %1747 }
 0x653   :  { %v575_v52 = vsub.f32 1.0, %v1748_v22 }
 0x6a3   :  { %v587_v26 = vpop.permute.xlu1 %586  ;;  %v566_v27 = vpop.permute.xlu0 %565 }
 0x6a4   :  { %v589_v28 = vadd.f32 %v1645_v21, %v587_v26  ;;  %v568_v29 = vmul.f32 %v1748_v22, %v566_v27 }
 0x6a6   :  { %v1648_v30 = vmul.f32 -1.442695, %v589_v28  ;;  %570 = vrot.lane.b32.xlu1 %v568_v29, %s1905_s9 }
 0x6a7   :  { %v608_v17 = vpop.permute.xlu0 %607 }
 0x6a8   :  { %1749 = vpow2.f32 %v1648_v30 }
 0x6aa   :  { %631 = vperm.xlu1 %1711, %v2185_v31  }
 0x6ae   :  { %581 = vrot.lane.b32.xlu1 %v2150_v55, %s1907_s10 }
 0x6b2   :  { %643 = vperm.xlu1 %1711, %v2192_v32  }
 0x6b5   :  { %v1750_v33 = vpop.eup %1749 }
 0x6b6   :  { %v593_v36 = vadd.f32 1.0, %v1750_v33 }
 0x6b8   :  { %1751 = vrcp.f32 %v593_v36 }
 0x6c5   :  { %v1752_v37 = vpop.eup %1751 }
 0x6c6   :  { %v610_v40 = vmul.f32 %v1752_v37, %v608_v17 }
 0x6c8   :  { %612 = vrot.lane.b32.xlu0 %v610_v40, %s1905_s9 }
 0x718   :  { %v571_v42 = vpop.permute.xlu1 %570 }
 0x719   :  { %v573_v43 = vadd.f32 %v1644_v61, %v571_v42 }
 0x71b   :  { %1753 = vtanh.f32 %v573_v43 }
 0x725   :  { %v632_v50 = vpop.permute.xlu1 %631 }
 0x726   :  { %vm633_vm13 = vcmp.eq.s32.totalorder %v632_v50, 1  ;;  %v1655_v50 = vld [vmem:[%s2507_s2 + $0x10] sm:$0x7] }
 0x728   :  { %v1754_v45 = vpop.eup %1753 }
 0x729   :  { %577 = vrot.lane.b32.xlu0 %v1754_v45, %s1906_s4  ;;  %v582_v51 = vpop.permute.xlu1 %581  ;;  %v1654_v45 = vld [vmem:[%s2506_s1 + $0xc] sm:$0x7] }
 0x72a   :  { %v584_v54 = vmul.f32 %v1748_v22, %v582_v51 }
 0x72d   :  { %597 = vrot.lane.b32.xlu0 %v555_v60, %s1907_s10  ;;  %v644_v29 = vpop.permute.xlu1 %643 }
 0x72e   :  { %vm645_vm14 = vcmp.eq.s32.totalorder %v644_v29, 1 }
 0x73a   :  { %v613_v46 = vpop.permute.xlu0 %612 }
 0x73b   :  { %v615_v47 = vadd.f32 %v1645_v21, %v613_v46 }
 0x73d   :  { %1755 = vtanh.f32 %v615_v47 }
 0x74a   :  { %v1756_v48 = vpop.eup %1755 }
 0x74b   :  { %619 = vrot.lane.b32.xlu0 %v1756_v48, %s1906_s4 }
 0x79b   :  { %v578_v53 = vpop.permute.xlu0 %577 }
 0x79c   :  { %v580_v38 = vmul.f32 %v578_v53, %v575_v52 }
 0x79e   :  { %v585_v58 = vadd.f32 %v584_v54, %v580_v38 }
 0x79f   :  { %v598_v59 = vpop.permute.xlu0 %597 }
 0x7a0   :  { %v600_v61 = vadd.f32 %v1645_v21, %v598_v59  ;;  %v653_v62 = vsel %vm633_vm13, %v585_v58, %v582_v51  ;;  %v2199_v63 = vsel %vm633_vm13, %v585_v58, 0.0  ;;  %v2242_v59 = vsel %vm1660_vm15, 1, %v1904_v23 }
 0x7a1   :  { %656 = vrot.lane.b32.xlu1 %v653_v62, %s1906_s4 }
 0x7a2   :  { %v1649_v60 = vmul.f32 -1.442695, %v600_v61  ;;  %v2249_v61 = vsel %vm1661_vm2, 1, %v1904_v23 }
 0x7a4   :  { %1757 = vpow2.f32 %v1649_v60 }
 0x7b1   :  { %v1758_v18 = vpop.eup %1757 }
 0x7b2   :  { %v604_v19 = vadd.f32 1.0, %v1758_v18 }
 0x7b4   :  { %1759 = vrcp.f32 %v604_v19 }
 0x7bd   :  { %v620_v28 = vpop.permute.xlu0 %619 }
 0x7c1   :  { %v1760_v26 = vpop.eup %1759 }
 0x7c2   :  { %v617_v27 = vsub.f32 1.0, %v1760_v26  ;;  %v623_v22 = vmul.f32 %v1760_v26, %v2150_v55 }
 0x7c4   :  { %v622_v30 = vmul.f32 %v620_v28, %v617_v27 }
 0x7c6   :  { %v624_v33 = vadd.f32 %v623_v22, %v622_v30 }
 0x7c8   :  { %v2203_v21 = vsel %vm645_vm14, %v624_v33, 0.0  ;;  %v654_v36 = vsel %vm645_vm14, %v624_v33, %v2150_v55 }
 0x813   :  { %v657_v37 = vpop.permute.xlu1 %656 }
 0x814   :  { %v2207_v17 = vsel %vm292_vm6, %v657_v37, %v654_v36 }
 0x815   :  { %1656 = vmatmul.mubr.msk.f32.vlgmr.msra.gmra.mxu1 %vm115_vm1, %v2207_v17 }
 0x816   :  { %1052 = vmatpush1.msra.mxu1 %v1958_v2  ;;  %1099 = vmatprep.mubr.f32.mxu1 %v1903_v0 }
 0x817   :  { %1053 = vmatprep.subr.mxu1 %v1960_v3 }
 0x818   :  { %1054 = vmatpush1.msra.mxu1 %v1963_v4 }
 0x819   :  { %1055 = vmatprep.subr.mxu1 %v1967_v5 }
 0x81a   :  { %1056 = vmatpush1.msra.mxu1 %v1971_v6 }
 0x81b   :  { %1057 = vmatprep.subr.mxu1 %v1975_v7 }
 0x81c   :  { %1058 = vmatpush1.msra.mxu1 %v1979_v8 }
 0x81d   :  { %1059 = vmatprep.subr.mxu1 %v1983_v9 }
 0x81e   :  { %1060 = vmatpush1.msra.mxu1 %v1987_v10 }
 0x81f   :  { %1061 = vmatprep.subr.mxu1 %v1991_v11 }
 0x820   :  { %1062 = vmatpush1.msra.mxu1 %v1995_v12 }
 0x821   :  { %1063 = vmatprep.subr.mxu1 %v1999_v13 }
 0x822   :  { %1064 = vmatpush1.msra.mxu1 %v2003_v14 }
 0x823   :  { %1065 = vmatprep.subr.mxu1 %v2007_v15 }
 0x824   :  { %1066 = vmatpush1.msra.mxu1 %v2011_v16 }
 0x825   :  { %1416 = vmatprep.subr.mxu1 %v1956_v1 }
 0x8d5   :  { %v735_v55 = vpop.f32.mrf.mxu1 }
 0x8d6   :  { %v736_v40 = vadd.f32 %v735_v55, %v2048_v24 }
 0x8d7   :  { %v737_v42 = vpop.f32.mrf.mxu1 }
 0x8d8   :  { %769 = vrot.lane.b32.xlu1 %v736_v40, %s1907_s10  ;;  %748 = vrot.lane.b32.xlu0 %v736_v40, %s1905_s9  ;;  %v738_v43 = vadd.f32 %v737_v42, %v2050_v25  ;;  %v740_v46 = vadd.f32 %v1654_v45, %v736_v40 }
 0x8da   :  { %v1657_v47 = vmul.f32 -1.442695, %v740_v46 }
 0x8dc   :  { %790 = vrot.lane.b32.xlu0 %v738_v43, %s1906_s4  ;;  %1761 = vpow2.f32 %v1657_v47 }
 0x8e9   :  { %v1762_v1 = vpop.eup %1761 }
 0x8ea   :  { %v744_v48 = vadd.f32 1.0, %v1762_v1 }
 0x8ec   :  { %1763 = vrcp.f32 %v744_v48 }
 0x8f9   :  { %v1764_v51 = vpop.eup %1763 }
 0x8fa   :  { %v758_v36 = vsub.f32 1.0, %v1764_v51 }
 0x94a   :  { %v770_v52 = vpop.permute.xlu1 %769  ;;  %v749_v53 = vpop.permute.xlu0 %748 }
 0x94b   :  { %v772_v54 = vadd.f32 %v1655_v50, %v770_v52  ;;  %v751_v38 = vmul.f32 %v1764_v51, %v749_v53 }
 0x94d   :  { %v1658_v58 = vmul.f32 -1.442695, %v772_v54  ;;  %753 = vrot.lane.b32.xlu1 %v751_v38, %s1905_s9 }
 0x94e   :  { %v791_v19 = vpop.permute.xlu0 %790 }
 0x94f   :  { %1765 = vpow2.f32 %v1658_v58 }
 0x951   :  { %814 = vperm.xlu1 %1711, %v2242_v59  }
 0x955   :  { %764 = vrot.lane.b32.xlu1 %v2207_v17, %s1907_s10 }
 0x959   :  { %826 = vperm.xlu1 %1711, %v2249_v61  }
 0x95c   :  { %v1766_v62 = vpop.eup %1765 }
 0x95d   :  { %v776_v60 = vadd.f32 1.0, %v1766_v62 }
 0x95f   :  { %1767 = vrcp.f32 %v776_v60 }
 0x96c   :  { %v1768_v18 = vpop.eup %1767 }
 0x96d   :  { %v793_v26 = vmul.f32 %v1768_v18, %v791_v19 }
 0x96f   :  { %795 = vrot.lane.b32.xlu0 %v793_v26, %s1905_s9 }
 0x9bf   :  { %v754_v27 = vpop.permute.xlu1 %753 }
 0x9c0   :  { %v756_v28 = vadd.f32 %v1654_v45, %v754_v27 }
 0x9c2   :  { %1769 = vtanh.f32 %v756_v28 }
 0x9cc   :  { %v815_v30 = vpop.permute.xlu1 %814 }
 0x9cd   :  { %vm816_vm3 = vcmp.eq.s32.totalorder %v815_v30, 1 }
 0x9cf   :  { %v1770_v35 = vpop.eup %1769 }
 0x9d0   :  { %760 = vrot.lane.b32.xlu0 %v1770_v35, %s1906_s4  ;;  %v765_v33 = vpop.permute.xlu1 %764 }
 0x9d1   :  { %v767_v55 = vmul.f32 %v1764_v51, %v765_v33 }
 0x9d4   :  { %780 = vrot.lane.b32.xlu0 %v738_v43, %s1907_s10  ;;  %v827_v58 = vpop.permute.xlu1 %826 }
 0x9d5   :  { %vm828_vm4 = vcmp.eq.s32.totalorder %v827_v58, 1 }
 0x9e1   :  { %v796_v23 = vpop.permute.xlu0 %795 }
 0x9e2   :  { %v798_v29 = vadd.f32 %v1655_v50, %v796_v23 }
 0x9e4   :  { %1771 = vtanh.f32 %v798_v29 }
 0x9f1   :  { %v1772_v22 = vpop.eup %1771 }
 0x9f2   :  { %802 = vrot.lane.b32.xlu0 %v1772_v22, %s1906_s4 }
 0xa42   :  { %v761_v37 = vpop.permute.xlu0 %760 }
 0xa43   :  { %v763_v40 = vmul.f32 %v761_v37, %v758_v36 }
 0xa45   :  { %v768_v42 = vadd.f32 %v767_v55, %v763_v40 }
 0xa46   :  { %v781_v45 = vpop.permute.xlu0 %780 }
 0xa47   :  { %v783_v46 = vadd.f32 %v1655_v50, %v781_v45  ;;  %v836_v47 = vsel %vm816_vm3, %v768_v42, %v765_v33  ;;  %v2256_v1 = vsel %vm816_vm3, %v768_v42, 0.0 }
 0xa48   :  { %839 = vrot.lane.b32.xlu1 %v836_v47, %s1906_s4 }
 0xa49   :  { %v1659_v43 = vmul.f32 -1.442695, %v783_v46 }
 0xa4b   :  { %1773 = vpow2.f32 %v1659_v43 }
 0xa58   :  { %v1774_v48 = vpop.eup %1773 }
 0xa59   :  { %v787_v52 = vadd.f32 1.0, %v1774_v48 }
 0xa5b   :  { %1775 = vrcp.f32 %v787_v52 }
 0xa64   :  { %v803_v38 = vpop.permute.xlu0 %802 }
 0xa68   :  { %v1776_v53 = vpop.eup %1775 }
 0xa69   :  { %v800_v54 = vsub.f32 1.0, %v1776_v53  ;;  %v806_v51 = vmul.f32 %v1776_v53, %v2207_v17 }
 0xa6b   :  { %v805_v62 = vmul.f32 %v803_v38, %v800_v54 }
 0xa6d   :  { %v807_v60 = vadd.f32 %v806_v51, %v805_v62 }
 0xa6f   :  { %v2260_v50 = vsel %vm828_vm4, %v807_v60, 0.0  ;;  %v837_v18 = vsel %vm828_vm4, %v807_v60, %v2207_v17 }
 0xaba   :  { %v840_v19 = vpop.permute.xlu1 %839 }
 0xabb   :  { %v2264_v26 = vsel %vm292_vm6, %v840_v19, %v837_v18 }
 0xabc   :  { %1666 = vmatmul.mubr.msk.f32.vlgmr.msra.gmra.mxu0 %vm115_vm1, %v2264_v26 }
 0xabd   :  { %1235 = vmatpush1.msra.mxu0 %v1958_v2  ;;  %1282 = vmatprep.mubr.f32.mxu0 %v1903_v0 }
 0xabe   :  { %1236 = vmatprep.subr.mxu0 %v1960_v3 }
 0xabf   :  { %1237 = vmatpush1.msra.mxu0 %v1963_v4 }
 0xac0   :  { %1238 = vmatprep.subr.mxu0 %v1967_v5 }
 0xac1   :  { %1239 = vmatpush1.msra.mxu0 %v1971_v6  ;;  %v1664_v6 = vld [vmem:[%s2506_s1 + $0x10] sm:$0x7] }
 0xac2   :  { %1240 = vmatprep.subr.mxu0 %v1975_v7 }
 0xac3   :  { %1241 = vmatpush1.msra.mxu0 %v1979_v8 }
 0xac4   :  { %1242 = vmatprep.subr.mxu0 %v1983_v9 }
 0xac5   :  { %1243 = vmatpush1.msra.mxu0 %v1987_v10 }
 0xac6   :  { %1244 = vmatprep.subr.mxu0 %v1991_v11  ;;  %v1665_v11 = vld [vmem:[%s2507_s2 + $0xc] sm:$0x7] }
 0xac7   :  { %1245 = vmatpush1.msra.mxu0 %v1995_v12 }
 0xac8   :  { %1246 = vmatprep.subr.mxu0 %v1999_v13 }
 0xac9   :  { %1247 = vmatpush1.msra.mxu0 %v2003_v14 }
 0xaca   :  { %1248 = vmatprep.subr.mxu0 %v2007_v15 }
 0xacb   :  { %1249 = vmatpush1.msra.mxu0 %v2011_v16 }
 0xb7c   :  { %v918_v2 = vpop.f32.mrf.mxu0 }
 0xb7d   :  { %v919_v3 = vadd.f32 %v918_v2, %v2048_v24 }
 0xb7e   :  { %v920_v4 = vpop.f32.mrf.mxu0 }
 0xb7f   :  { %952 = vrot.lane.b32.xlu1 %v919_v3, %s1907_s10  ;;  %931 = vrot.lane.b32.xlu0 %v919_v3, %s1905_s9  ;;  %v921_v5 = vadd.f32 %v920_v4, %v2050_v25  ;;  %v923_v7 = vadd.f32 %v1664_v6, %v919_v3 }
 0xb81   :  { %v1667_v8 = vmul.f32 -1.442695, %v923_v7 }
 0xb83   :  { %973 = vrot.lane.b32.xlu0 %v921_v5, %s1906_s4  ;;  %1777 = vpow2.f32 %v1667_v8  ;;  %v1841_v8 = vld [vmem:[#allocation2 + $0x70] sm:$0xff] }
 0xb90   :  { %v1778_v9 = vpop.eup %1777 }
 0xb91   :  { %v927_v10 = vadd.f32 1.0, %v1778_v9  ;;  %v1842_v9 = vld [vmem:[#allocation2 + $0x68] sm:$0xff] }
 0xb93   :  { %1779 = vrcp.f32 %v927_v10  ;;  %v1843_v10 = vld [vmem:[#allocation2 + $0x60] sm:$0xff] }
 0xba0   :  { %v1780_v12 = vpop.eup %1779 }
 0xba1   :  { %v941_v40 = vsub.f32 1.0, %v1780_v12 }
 0xbf1   :  { %v953_v13 = vpop.permute.xlu1 %952  ;;  %v932_v14 = vpop.permute.xlu0 %931 }
 0xbf2   :  { %v955_v15 = vadd.f32 %v1665_v11, %v953_v13  ;;  %v934_v16 = vmul.f32 %v1780_v12, %v932_v14  ;;  %v1847_v13 = vld [vmem:[#allocation2 + $0x40] sm:$0xff]  ;;  %v1848_v14 = vld [vmem:[#allocation2 + $0x38] sm:$0xff] }
 0xbf4   :  { %v1668_v17 = vmul.f32 -1.442695, %v955_v15  ;;  %936 = vrot.lane.b32.xlu1 %v934_v16, %s1905_s9  ;;  %v1849_v15 = vld [vmem:[#allocation2 + $0x30] sm:$0xff]  ;;  %v1850_v16 = vld [vmem:[#allocation2 + $0x28] sm:$0xff] }
 0xbf5   :  { %v974_v23 = vpop.permute.xlu0 %973 }
 0xbf6   :  { %1781 = vpow2.f32 %v1668_v17  ;;  %v1851_v17 = vld [vmem:[#allocation2 + $0x20] sm:$0xff] }
 0xbf8   :  { %997 = vperm.xlu1 %1711, %v2249_v61  }
 0xbfc   :  { %947 = vrot.lane.b32.xlu1 %v2264_v26, %s1907_s10 }
 0xc00   :  { %1009 = vperm.xlu1 %1711, %v2242_v59  }
 0xc03   :  { %v1782_v27 = vpop.eup %1781 }
 0xc04   :  { %v959_v28 = vadd.f32 1.0, %v1782_v27  ;;  %v1853_v27 = vld [vmem:[#allocation2 + $0x10] sm:$0xff] }
 0xc06   :  { %1783 = vrcp.f32 %v959_v28  ;;  %v1854_v28 = vld [vmem:[#allocation2 + $0x8] sm:$0xff] }
 0xc13   :  { %v1784_v35 = vpop.eup %1783 }
 0xc14   :  { %v976_v29 = vmul.f32 %v1784_v35, %v974_v23  ;;  %v1855_v35 = vld [vmem:[#allocation2] sm:$0xff] }
 0xc16   :  { %978 = vrot.lane.b32.xlu0 %v976_v29, %s1905_s9 }
 0xc66   :  { %v937_v22 = vpop.permute.xlu1 %936 }
 0xc67   :  { %v939_v30 = vadd.f32 %v1664_v6, %v937_v22 }
 0xc69   :  { %1785 = vtanh.f32 %v939_v30 }
 0xc73   :  { %v998_v37 = vpop.permute.xlu1 %997 }
 0xc74   :  { %vm999_vm5 = vcmp.eq.s32.totalorder %v998_v37, 1 }
 0xc76   :  { %v1786_v33 = vpop.eup %1785 }
 0xc77   :  { %943 = vrot.lane.b32.xlu0 %v1786_v33, %s1906_s4  ;;  %v948_v55 = vpop.permute.xlu1 %947  ;;  %v1674_v33 = vld [vmem:[%s2506_s1 + $0x14] sm:$0x7] }
 0xc78   :  { %v950_v45 = vmul.f32 %v1780_v12, %v948_v55  ;;  %v1845_v12 = vld [vmem:[#allocation2 + $0x50] sm:$0xff] }
 0xc7b   :  { %963 = vrot.lane.b32.xlu0 %v921_v5, %s1907_s10  ;;  %v1010_v18 = vpop.permute.xlu1 %1009 }
 0xc7c   :  { %vm1011_vm7 = vcmp.eq.s32.totalorder %v1010_v18, 1 }
 0xc88   :  { %v979_v61 = vpop.permute.xlu0 %978 }
 0xc89   :  { %v981_v36 = vadd.f32 %v1665_v11, %v979_v61 }
 0xc8b   :  { %1787 = vtanh.f32 %v981_v36 }
 0xc98   :  { %v1788_v59 = vpop.eup %1787 }
 0xc99   :  { %985 = vrot.lane.b32.xlu0 %v1788_v59, %s1906_s4 }
 0xce9   :  { %v944_v42 = vpop.permute.xlu0 %943 }
 0xcea   :  { %v946_v46 = vmul.f32 %v944_v42, %v941_v40 }
 0xcec   :  { %v951_v47 = vadd.f32 %v950_v45, %v946_v46 }
 0xced   :  { %v964_v43 = vpop.permute.xlu0 %963 }
 0xcee   :  { %v966_v48 = vadd.f32 %v1665_v11, %v964_v43  ;;  %v1019_v52 = vsel %vm999_vm5, %v951_v47, %v948_v55  ;;  %v2304_v53 = vsel %vm999_vm5, %v951_v47, 0.0  ;;  %v1844_v11 = vld [vmem:[#allocation2 + $0x58] sm:$0xff]  ;;  %v1675_v55 = vld [vmem:[%s2507_s2 + $0x8] sm:$0x7] }
 0xcef   :  { %1022 = vrot.lane.b32.xlu1 %v1019_v52, %s1906_s4 }
 0xcf0   :  { %v1669_v54 = vmul.f32 -1.442695, %v966_v48 }
 0xcf2   :  { %1789 = vpow2.f32 %v1669_v54 }
 0xcff   :  { %v1790_v38 = vpop.eup %1789 }
 0xd00   :  { %v970_v58 = vadd.f32 1.0, %v1790_v38 }
 0xd02   :  { %1791 = vrcp.f32 %v970_v58 }
 0xd0b   :  { %v986_v60 = vpop.permute.xlu0 %985 }
 0xd0f   :  { %v1792_v51 = vpop.eup %1791 }
 0xd10   :  { %v983_v62 = vsub.f32 1.0, %v1792_v51  ;;  %v989_v19 = vmul.f32 %v1792_v51, %v2264_v26 }
 0xd12   :  { %v988_v2 = vmul.f32 %v986_v60, %v983_v62 }
 0xd14   :  { %v990_v3 = vadd.f32 %v989_v19, %v988_v2 }
 0xd16   :  { %v2308_v4 = vsel %vm1011_vm7, %v990_v3, 0.0  ;;  %v1020_v5 = vsel %vm1011_vm7, %v990_v3, %v2264_v26  ;;  %v1846_v26 = vld [vmem:[#allocation2 + $0x48] sm:$0xff] }
 0xd61   :  { %v1023_v6 = vpop.permute.xlu1 %1022 }
 0xd62   :  { %v2312_v7 = vsel %vm292_vm6, %v1023_v6, %v1020_v5 }
 0xd63   :  { %1676 = vmatmul.mubr.msk.f32.vlgmr.msra.gmra.mxu1 %vm115_vm1, %v2312_v7 }
 0xd64   :  { %1417 = vmatpush1.msra.mxu1 %v1841_v8  ;;  %1464 = vmatprep.mubr.f32.mxu1 %v1903_v0  ;;  %v1852_v0 = vld [vmem:[#allocation2 + $0x18] sm:$0xff] }
 0xd65   :  { %1418 = vmatprep.subr.mxu1 %v1842_v9 }
 0xd66   :  { %1419 = vmatpush1.msra.mxu1 %v1843_v10 }
 0xd67   :  { %1420 = vmatprep.subr.mxu1 %v1844_v11 }
 0xd68   :  { %1421 = vmatpush1.msra.mxu1 %v1845_v12 }
 0xd69   :  { %1422 = vmatprep.subr.mxu1 %v1846_v26 }
 0xd6a   :  { %1423 = vmatpush1.msra.mxu1 %v1847_v13 }
 0xd6b   :  { %1424 = vmatprep.subr.mxu1 %v1848_v14 }
 0xd6c   :  { %1425 = vmatpush1.msra.mxu1 %v1849_v15 }
 0xd6d   :  { %1426 = vmatprep.subr.mxu1 %v1850_v16 }
 0xd6e   :  { %1427 = vmatpush1.msra.mxu1 %v1851_v17 }
 0xd6f   :  { %1428 = vmatprep.subr.mxu1 %v1852_v0 }
 0xd70   :  { %1429 = vmatpush1.msra.mxu1 %v1853_v27 }
 0xd71   :  { %1430 = vmatprep.subr.mxu1 %v1854_v28 }
 0xd72   :  { %1431 = vmatpush1.msra.mxu1 %v1855_v35 }
 0xe23   :  { %v1101_v23 = vpop.f32.mrf.mxu1 }
 0xe24   :  { %v1102_v29 = vadd.f32 %v1101_v23, %v2048_v24 }
 0xe25   :  { %v1103_v22 = vpop.f32.mrf.mxu1 }
 0xe26   :  { %1135 = vrot.lane.b32.xlu1 %v1102_v29, %s1907_s10  ;;  %1114 = vrot.lane.b32.xlu0 %v1102_v29, %s1905_s9  ;;  %v1104_v30 = vadd.f32 %v1103_v22, %v2050_v25  ;;  %v1106_v61 = vadd.f32 %v1674_v33, %v1102_v29 }
 0xe28   :  { %v1677_v36 = vmul.f32 -1.442695, %v1106_v61 }
 0xe2a   :  { %1156 = vrot.lane.b32.xlu0 %v1104_v30, %s1906_s4  ;;  %1793 = vpow2.f32 %v1677_v36 }
 0xe37   :  { %v1794_v59 = vpop.eup %1793 }
 0xe38   :  { %v1110_v37 = vadd.f32 1.0, %v1794_v59 }
 0xe3a   :  { %1795 = vrcp.f32 %v1110_v37 }
 0xe47   :  { %v1796_v40 = vpop.eup %1795 }
 0xe48   :  { %v1124_v3 = vsub.f32 1.0, %v1796_v40 }
 0xe98   :  { %v1136_v42 = vpop.permute.xlu1 %1135  ;;  %v1115_v45 = vpop.permute.xlu0 %1114 }
 0xe99   :  { %v1138_v46 = vadd.f32 %v1675_v55, %v1136_v42  ;;  %v1117_v47 = vmul.f32 %v1796_v40, %v1115_v45 }
 0xe9b   :  { %v1678_v43 = vmul.f32 -1.442695, %v1138_v46  ;;  %1119 = vrot.lane.b32.xlu1 %v1117_v47, %s1905_s9  ;;  %v1685_v46 = vld [vmem:[%s2507_s2 + $0x4] sm:$0x7] }
 0xe9c   :  { %v1157_v38 = vpop.permute.xlu0 %1156 }
 0xe9d   :  { %1797 = vpow2.f32 %v1678_v43 }
 0xe9f   :  { %1180 = vperm.xlu1 %1711, %v2192_v32  }
 0xea3   :  { %1130 = vrot.lane.b32.xlu1 %v2312_v7, %s1907_s10 }
 0xea7   :  { %1192 = vperm.xlu1 %1711, %v2185_v31  }
 0xeaa   :  { %v1798_v48 = vpop.eup %1797 }
 0xeab   :  { %v1142_v52 = vadd.f32 1.0, %v1798_v48 }
 0xead   :  { %1799 = vrcp.f32 %v1142_v52 }
 0xeba   :  { %v1800_v54 = vpop.eup %1799 }
 0xebb   :  { %v1159_v58 = vmul.f32 %v1800_v54, %v1157_v38 }
 0xebd   :  { %1161 = vrot.lane.b32.xlu0 %v1159_v58, %s1905_s9 }
 0xf0d   :  { %v1120_v51 = vpop.permute.xlu1 %1119 }
 0xf0e   :  { %v1122_v62 = vadd.f32 %v1674_v33, %v1120_v51 }
 0xf10   :  { %1801 = vtanh.f32 %v1122_v62 }
 0xf1a   :  { %v1181_v19 = vpop.permute.xlu1 %1180 }
 0xf1b   :  { %vm1182_vm8 = vcmp.eq.s32.totalorder %v1181_v19, 1 }
 0xf1d   :  { %v1802_v60 = vpop.eup %1801 }
 0xf1e   :  { %1126 = vrot.lane.b32.xlu0 %v1802_v60, %s1906_s4  ;;  %v1131_v2 = vpop.permute.xlu1 %1130 }
 0xf1f   :  { %v1133_v6 = vmul.f32 %v1796_v40, %v1131_v2 }
 0xf22   :  { %1146 = vrot.lane.b32.xlu0 %v1104_v30, %s1907_s10  ;;  %v1193_v27 = vpop.permute.xlu1 %1192 }
 0xf23   :  { %vm1194_vm9 = vcmp.eq.s32.totalorder %v1193_v27, 1 }
 0xf2f   :  { %v1162_v32 = vpop.permute.xlu0 %1161 }
 0xf30   :  { %v1164_v18 = vadd.f32 %v1675_v55, %v1162_v32 }
 0xf32   :  { %1803 = vtanh.f32 %v1164_v18 }
 0xf3f   :  { %v1804_v31 = vpop.eup %1803 }
 0xf40   :  { %1168 = vrot.lane.b32.xlu0 %v1804_v31, %s1906_s4 }
 0xf90   :  { %v1127_v5 = vpop.permute.xlu0 %1126 }
 0xf91   :  { %v1129_v8 = vmul.f32 %v1127_v5, %v1124_v3 }
 0xf93   :  { %v1134_v9 = vadd.f32 %v1133_v6, %v1129_v8 }
 0xf94   :  { %v1147_v10 = vpop.permute.xlu0 %1146 }
 0xf95   :  { %v1149_v11 = vadd.f32 %v1675_v55, %v1147_v10  ;;  %v1202_v12 = vsel %vm1182_vm8, %v1134_v9, %v1131_v2  ;;  %v2337_v26 = vsel %vm1182_vm8, %v1134_v9, 0.0 }
 0xf96   :  { %1205 = vrot.lane.b32.xlu1 %v1202_v12, %s1906_s4 }
 0xf97   :  { %v1679_v13 = vmul.f32 -1.442695, %v1149_v11 }
 0xf99   :  { %1805 = vpow2.f32 %v1679_v13 }
 0xfa6   :  { %v1806_v14 = vpop.eup %1805 }
 0xfa7   :  { %v1153_v15 = vadd.f32 1.0, %v1806_v14 }
 0xfa9   :  { %1807 = vrcp.f32 %v1153_v15 }
 0xfb2   :  { %v1169_v0 = vpop.permute.xlu0 %1168 }
 0xfb6   :  { %v1808_v16 = vpop.eup %1807 }
 0xfb7   :  { %v1166_v17 = vsub.f32 1.0, %v1808_v16  ;;  %v1172_v28 = vmul.f32 %v1808_v16, %v2312_v7 }
 0xfb9   :  { %v1171_v35 = vmul.f32 %v1169_v0, %v1166_v17 }
 0xfbb   :  { %v1173_v23 = vadd.f32 %v1172_v28, %v1171_v35 }
 0xfbd   :  { %v2341_v29 = vsel %vm1194_vm9, %v1173_v23, 0.0  ;;  %v1203_v22 = vsel %vm1194_vm9, %v1173_v23, %v2312_v7  ;;  %v1684_v7 = vld [vmem:[%s2506_s1 + $0x18] sm:$0x7] }
0x1008   :  { %v1206_v30 = vpop.permute.xlu1 %1205 }
0x1009   :  { %v2345_v33 = vsel %vm292_vm6, %v1206_v30, %v1203_v22 }
0x100a   :  { %1686 = vmatmul.mubr.msk.f32.vlgmr.msra.gmra.mxu0 %vm115_vm1, %v2345_v33 }
0x10ca   :  { %v1284_v61 = vpop.f32.mrf.mxu0 }
0x10cb   :  { %v1285_v36 = vadd.f32 %v1284_v61, %v2048_v24 }
0x10cc   :  { %v1286_v59 = vpop.f32.mrf.mxu0 }
0x10cd   :  { %1318 = vrot.lane.b32.xlu1 %v1285_v36, %s1907_s10  ;;  %1297 = vrot.lane.b32.xlu0 %v1285_v36, %s1905_s9  ;;  %v1287_v37 = vadd.f32 %v1286_v59, %v2050_v25  ;;  %v1289_v55 = vadd.f32 %v1684_v7, %v1285_v36 }
0x10cf   :  { %v1687_v40 = vmul.f32 -1.442695, %v1289_v55 }
0x10d1   :  { %1339 = vrot.lane.b32.xlu0 %v1287_v37, %s1906_s4  ;;  %1809 = vpow2.f32 %v1687_v40 }
0x10de   :  { %v1810_v42 = vpop.eup %1809 }
0x10df   :  { %v1293_v45 = vadd.f32 1.0, %v1810_v42 }
0x10e1   :  { %1811 = vrcp.f32 %v1293_v45 }
0x10ee   :  { %v1812_v47 = vpop.eup %1811 }
0x10ef   :  { %v1307_v6 = vsub.f32 1.0, %v1812_v47 }
0x113f   :  { %v1319_v43 = vpop.permute.xlu1 %1318  ;;  %v1298_v48 = vpop.permute.xlu0 %1297 }
0x1140   :  { %v1321_v52 = vadd.f32 %v1685_v46, %v1319_v43  ;;  %v1300_v54 = vmul.f32 %v1812_v47, %v1298_v48 }
0x1142   :  { %v1688_v38 = vmul.f32 -1.442695, %v1321_v52  ;;  %1302 = vrot.lane.b32.xlu1 %v1300_v54, %s1905_s9 }
0x1143   :  { %v1340_v60 = vpop.permute.xlu0 %1339 }
0x1144   :  { %1813 = vpow2.f32 %v1688_v38 }
0x1146   :  { %1363 = vperm.xlu1 %1711, %v2135_v57  }
0x114a   :  { %1313 = vrot.lane.b32.xlu1 %v2345_v33, %s1907_s10 }
0x114e   :  { %1375 = vperm.xlu1 %1711, %v2128_v56  }
0x1151   :  { %v1814_v58 = vpop.eup %1813 }
0x1152   :  { %v1325_v51 = vadd.f32 1.0, %v1814_v58 }
0x1154   :  { %1815 = vrcp.f32 %v1325_v51 }
0x1161   :  { %v1816_v62 = vpop.eup %1815 }
0x1162   :  { %v1342_v32 = vmul.f32 %v1816_v62, %v1340_v60 }
0x1164   :  { %1344 = vrot.lane.b32.xlu0 %v1342_v32, %s1905_s9 }
0x11b4   :  { %v1303_v18 = vpop.permute.xlu1 %1302 }
0x11b5   :  { %v1305_v31 = vadd.f32 %v1684_v7, %v1303_v18 }
0x11b7   :  { %1817 = vtanh.f32 %v1305_v31 }
0x11c1   :  { %v1364_v3 = vpop.permute.xlu1 %1363 }
0x11c2   :  { %vm1365_vm10 = vcmp.eq.s32.totalorder %v1364_v3, 1 }
0x11c4   :  { %v1818_v19 = vpop.eup %1817 }
0x11c5   :  { %1309 = vrot.lane.b32.xlu0 %v1818_v19, %s1906_s4  ;;  %v1314_v5 = vpop.permute.xlu1 %1313 }
0x11c6   :  { %v1316_v9 = vmul.f32 %v1812_v47, %v1314_v5 }
0x11c9   :  { %1329 = vrot.lane.b32.xlu0 %v1287_v37, %s1907_s10  ;;  %v1376_v23 = vpop.permute.xlu1 %1375 }
0x11ca   :  { %vm1377_vm11 = vcmp.eq.s32.totalorder %v1376_v23, 1 }
0x11d6   :  { %v1345_v57 = vpop.permute.xlu0 %1344 }
0x11d7   :  { %v1347_v2 = vadd.f32 %v1685_v46, %v1345_v57 }
0x11d9   :  { %1819 = vtanh.f32 %v1347_v2 }
0x11e6   :  { %v1820_v56 = vpop.eup %1819 }
0x11e7   :  { %1351 = vrot.lane.b32.xlu0 %v1820_v56, %s1906_s4 }
0x1237   :  { %v1310_v8 = vpop.permute.xlu0 %1309 }
0x1238   :  { %v1312_v10 = vmul.f32 %v1310_v8, %v1307_v6 }
0x123a   :  { %v1317_v11 = vadd.f32 %v1316_v9, %v1312_v10 }
0x123b   :  { %v1330_v12 = vpop.permute.xlu0 %1329 }
0x123c   :  { %v1332_v13 = vadd.f32 %v1685_v46, %v1330_v12  ;;  %v1385_v14 = vsel %vm1365_vm10, %v1317_v11, %v1314_v5  ;;  %v2369_v15 = vsel %vm1365_vm10, %v1317_v11, 0.0 }
0x123d   :  { %1388 = vrot.lane.b32.xlu1 %v1385_v14, %s1906_s4 }
0x123e   :  { %v1689_v16 = vmul.f32 -1.442695, %v1332_v13 }
0x1240   :  { %1821 = vpow2.f32 %v1689_v16 }
0x124d   :  { %v1822_v17 = vpop.eup %1821 }
0x124e   :  { %v1336_v0 = vadd.f32 1.0, %v1822_v17 }
0x1250   :  { %1823 = vrcp.f32 %v1336_v0 }
0x1259   :  { %v1352_v35 = vpop.permute.xlu0 %1351 }
0x125d   :  { %v1824_v27 = vpop.eup %1823 }
0x125e   :  { %v1349_v28 = vsub.f32 1.0, %v1824_v27  ;;  %v1355_v22 = vmul.f32 %v1824_v27, %v2345_v33 }
0x1260   :  { %v1354_v30 = vmul.f32 %v1352_v35, %v1349_v28 }
0x1262   :  { %v1356_v61 = vadd.f32 %v1355_v22, %v1354_v30 }
0x1264   :  { %v1378_v36 = vsel %vm1377_vm11, %v1356_v61, 0.0  ;;  %v1386_v59 = vsel %vm1377_vm11, %v1356_v61, %v2345_v33  ;;  %v1694_v33 = vld [vmem:[%s2506_s1 + $0x1c] sm:$0x7]  ;;  %s1908_s1 = smov [#allocation5]  }
0x12af   :  { %v1389_v37 = vpop.permute.xlu1 %1388 }
0x12b0   :  { %v2375_v7 = vsel %vm292_vm6, %v1389_v37, %v1386_v59 }
0x12b1   :  { %1695 = vmatmul.mubr.msk.f32.vlgmr.msra.gmra.mxu1 %vm115_vm1, %v2375_v7  ;;  %vm272_vm1 = vcmask 256000  }
0x1371   :  { %v1466_v55 = vpop.f32.mrf.mxu1 }
0x1372   :  { %v1467_v40 = vadd.f32 %v1466_v55, %v2048_v24  ;;  %v1396_v24 = vld [vmem:[%s2507_s2] sm:$0x7]  ;;  %s1593_s2 = sshll.u32 %s1908_s1, 4  ;;  %s1594_s2 = int_to_ptr.vmem [resolvable:$true] %s1593_s2 }
0x1373   :  { %v1468_v42 = vpop.f32.mrf.mxu1  ;;  %s1876_s21 = scalar_lea.vmem %s1594_s2, 64  ;;  %p1881_p6 = scmp.lt.s32.totalorder %s1594_s2, %s1594_s2 }
0x1374   :  { %1479 = vrot.lane.b32.xlu1 %v1467_v40, %s1905_s9  ;;  %1500 = vrot.lane.b32.xlu0 %v1467_v40, %s1907_s10  ;;  %v1469_v45 = vadd.f32 %v1468_v42, %v2050_v25  ;;  %v1471_v46 = vadd.f32 %v1694_v33, %v1467_v40  ;;  %p1877_p5 = scmp.ne.s32.totalorder %s1594_s2, %s1876_s21  ;;  %p1882_p7 = scmp.lt.s32.totalorder %s1876_s21, %s1876_s21 }
0x1376   :  { %v1696_v47 = vmul.f32 -1.442695, %v1471_v46  ;;  %p1883_p8 = por %p1882_p7, %p1881_p6 }
0x1378   :  { %1521 = vrot.lane.b32.xlu0 %v1469_v45, %s1906_s4  ;;  %1825 = vpow2.f32 %v1696_v47  ;;  %p1884_p9 = pnand %p1883_p8, %p1877_p5 }
0x1385   :  { %v1826_v43 = vpop.eup %1825 }
0x1386   :  { %v1475_v48 = vadd.f32 1.0, %v1826_v43 }
0x1388   :  { %1827 = vrcp.f32 %v1475_v48 }
0x1395   :  { %v2390_v52 = vpop.eup %1827 }
0x13e6   :  { %v1480_v54 = vpop.permute.xlu1 %1479  ;;  %v1501_v25 = vpop.permute.xlu0 %1500 }
0x13e7   :  { %v1482_v38 = vmul.f32 %v2390_v52, %v1480_v54  ;;  %v1503_v58 = vadd.f32 %v1501_v25, %v1396_v24 }
0x13e9   :  { %v1697_v51 = vmul.f32 -1.442695, %v1503_v58  ;;  %1484 = vrot.lane.b32.xlu1 %v1482_v38, %s1905_s9 }
0x13ea   :  { %v1522_v18 = vpop.permute.xlu0 %1521 }
0x13eb   :  { %1829 = vpow2.f32 %v1697_v51 }
0x13ed   :  { %1511 = vrot.lane.b32.xlu1 %v1469_v45, %s1907_s10 }
0x13f1   :  { %1495 = vrot.lane.b32.xlu1 %v2375_v7, %s1907_s10 }
0x13f8   :  { %v1830_v62 = vpop.eup %1829 }
0x13f9   :  { %v1507_v60 = vadd.f32 1.0, %v1830_v62 }
0x13fb   :  { %1831 = vrcp.f32 %v1507_v60 }
0x1408   :  { %v1832_v32 = vpop.eup %1831 }
0x1409   :  { %v1524_v31 = vmul.f32 %v1832_v32, %v1522_v18 }
0x140b   :  { %1526 = vrot.lane.b32.xlu0 %v1524_v31, %s1905_s9 }
0x140f   :  { %1545 = vperm.xlu0 %1712, %v2078_v44  }
0x1413   :  { %1557 = vperm.xlu0 %1712, %v2071_v41  }
0x1417   :  { %281 = vrot.lane.b32.xlu0 %v2089_v34, %s1906_s4 }
0x141b   :  { %465 = vrot.lane.b32.xlu0 %v2146_v49, %s1906_s4 }
0x141f   :  { %648 = vrot.lane.b32.xlu0 %v2203_v21, %s1906_s4 }
0x1423   :  { %831 = vrot.lane.b32.xlu0 %v2260_v50, %s1906_s4 }
0x1427   :  { %1014 = vrot.lane.b32.xlu0 %v2308_v4, %s1906_s4 }
0x142b   :  { %1197 = vrot.lane.b32.xlu0 %v2341_v29, %s1906_s4 }
0x142f   :  { %1380 = vrot.lane.b32.xlu0 %v1378_v36, %s1906_s4 }
0x145b   :  { %v1485_v41 = vpop.permute.xlu1 %1484 }
0x145c   :  { %v1487_v44 = vadd.f32 %v1694_v33, %v1485_v41 }
0x145e   :  { %1833 = vtanh.f32 %v1487_v44 }
0x146b   :  { %v1834_v34 = vpop.eup %1833 }
0x146c   :  { %1491 = vrot.lane.b32.xlu1 %v1834_v34, %s1906_s4 }
0x147d   :  { %v1527_v49 = vpop.permute.xlu0 %1526 }
0x147e   :  { %v1529_v19 = vadd.f32 %v1527_v49, %v1396_v24 }
0x1480   :  { %1835 = vtanh.f32 %v1529_v19 }
0x148a   :  { %v1546_v21 = vpop.permute.xlu0 %1545 }
0x148b   :  { %vm1547_vm12 = vcmp.eq.s32.totalorder %v1546_v21, 1 }
0x148d   :  { %v1836_v57 = vpop.eup %1835 }
0x148e   :  { %v1558_v50 = vpop.permute.xlu0 %1557  ;;  %1533 = vrot.lane.b32.xlu1 %v1836_v57, %s1906_s4 }
0x148f   :  { %vm1559_vm13 = vcmp.eq.s32.totalorder %v1558_v50, 1 }
0x1492   :  { %v282_v4 = vpop.permute.xlu0 %281  ;;  %269 = vrot.lane.b32.xlu1 %v2085_v20, %s1906_s4 }
0x1493   :  { %1633 = vst.msk [vmem:[%s2511_s6 + $0x1c] sm:$0x7] %vm272_vm1, %v282_v4 }
0x1496   :  { %v466_v29 = vpop.permute.xlu0 %465  ;;  %453 = vrot.lane.b32.xlu1 %v2142_v39, %s1906_s4 }
0x1497   :  { %1643 = vst.msk [vmem:[%s2511_s6 + $0x18] sm:$0x7] %vm272_vm1, %v466_v29 }
0x149a   :  { %v649_v2 = vpop.permute.xlu0 %648  ;;  %636 = vrot.lane.b32.xlu1 %v2199_v63, %s1906_s4 }
0x149b   :  { %1653 = vst.msk [vmem:[%s2511_s6 + $0x14] sm:$0x7] %vm272_vm1, %v649_v2 }
0x149e   :  { %v832_v20 = vpop.permute.xlu0 %831  ;;  %819 = vrot.lane.b32.xlu1 %v2256_v1, %s1906_s4 }
0x149f   :  { %1663 = vst.msk [vmem:[%s2511_s6 + $0x10] sm:$0x7] %vm272_vm1, %v832_v20 }
0x14a2   :  { %v1015_v39 = vpop.permute.xlu0 %1014  ;;  %1002 = vrot.lane.b32.xlu1 %v2304_v53, %s1906_s4  ;;  %v1512_v53 = vpop.permute.xlu1 %1511 }
0x14a3   :  { %1673 = vst.msk [vmem:[%s2511_s6 + $0xc] sm:$0x7] %vm272_vm1, %v1015_v39  ;;  %v1514_v56 = vadd.f32 %v1512_v53, %v1396_v24 }
0x14a5   :  { %v1698_v3 = vmul.f32 -1.442695, %v1514_v56 }
0x14a6   :  { %v1198_v63 = vpop.permute.xlu0 %1197  ;;  %1185 = vrot.lane.b32.xlu1 %v2337_v26, %s1906_s4  ;;  %v1496_v5 = vpop.permute.xlu1 %1495  ;;  %v1489_v26 = vsub.f32 1.0, %v2390_v52 }
0x14a7   :  { %1683 = vst.msk [vmem:[%s2511_s6 + $0x8] sm:$0x7] %vm272_vm1, %v1198_v63  ;;  %1837 = vpow2.f32 %v1698_v3  ;;  %v1498_v8 = vmul.f32 %v2390_v52, %v1496_v5 }
0x14aa   :  { %v1381_v1 = vpop.permute.xlu0 %1380  ;;  %1368 = vrot.lane.b32.xlu1 %v2369_v15, %s1906_s4 }
0x14ab   :  { %1693 = vst.msk [vmem:[%s2511_s6 + $0x4] sm:$0x7] %vm272_vm1, %v1381_v1 }
0x14b4   :  { %v1838_v13 = vpop.eup %1837 }
0x14b5   :  { %v1518_v14 = vadd.f32 1.0, %v1838_v13 }
0x14b7   :  { %1839 = vrcp.f32 %v1518_v14 }
0x14c4   :  { %v1840_v15 = vpop.eup %1839 }
0x14c5   :  { %v1531_v16 = vsub.f32 1.0, %v1840_v15  ;;  %v1537_v0 = vmul.f32 %v1840_v15, %v2375_v7 }
0x14de   :  { %v1492_v6 = vpop.permute.xlu1 %1491 }
0x14df   :  { %v1494_v9 = vmul.f32 %v1492_v6, %v1489_v26 }
0x14e1   :  { %v1499_v10 = vadd.f32 %v1498_v8, %v1494_v9 }
0x14e3   :  { %v1566_v11 = vsel %vm1547_vm12, %v1499_v10, %v1496_v5  ;;  %v1548_v12 = vsel %vm1547_vm12, %v1499_v10, 0.0 }
0x14e4   :  { %1569 = vrot.lane.b32.xlu0 %v1566_v11, %s1906_s4  ;;  %1550 = vrot.lane.b32.xlu1 %v1548_v12, %s1906_s4 }
0x1500   :  { %v1534_v17 = vpop.permute.xlu1 %1533 }
0x1501   :  { %v1536_v27 = vmul.f32 %v1534_v17, %v1531_v16 }
0x1503   :  { %v1538_v28 = vadd.f32 %v1537_v0, %v1536_v27 }
0x1504   :  { %v270_v35 = vpop.permute.xlu1 %269 }
0x1505   :  { %273 = vst.msk [vmem:[%s2510_s5] sm:$0x7] %vm272_vm1, %v270_v35  ;;  %v1560_v23 = vsel %vm1559_vm13, %v1538_v28, 0.0  ;;  %v1567_v22 = vsel %vm1559_vm13, %v1538_v28, %v2375_v7 }
0x1506   :  { %1562 = vrot.lane.b32.xlu0 %v1560_v23, %s1906_s4 }
0x1508   :  { %v454_v30 = vpop.permute.xlu1 %453 }
0x1509   :  { %1642 = vst.msk [vmem:[%s2510_s5 + $0x4] sm:$0x7] %vm272_vm1, %v454_v30 }
0x150c   :  { %v637_v61 = vpop.permute.xlu1 %636 }
0x150d   :  { %1652 = vst.msk [vmem:[%s2510_s5 + $0x8] sm:$0x7] %vm272_vm1, %v637_v61 }
0x1510   :  { %v820_v36 = vpop.permute.xlu1 %819 }
0x1511   :  { %1662 = vst.msk [vmem:[%s2510_s5 + $0xc] sm:$0x7] %vm272_vm1, %v820_v36 }
0x1514   :  { %v1003_v59 = vpop.permute.xlu1 %1002 }
0x1515   :  { %1672 = vst.msk [vmem:[%s2510_s5 + $0x10] sm:$0x7] %vm272_vm1, %v1003_v59 }
0x1518   :  { %v1186_v37 = vpop.permute.xlu1 %1185 }
0x1519   :  { %1682 = vst.msk [vmem:[%s2510_s5 + $0x14] sm:$0x7] %vm272_vm1, %v1186_v37 }
0x151c   :  { %v1369_v7 = vpop.permute.xlu1 %1368 }
0x151d   :  { %1692 = vst.msk [vmem:[%s2510_s5 + $0x18] sm:$0x7] %vm272_vm1, %v1369_v7 }
0x1556   :  { %v1570_v55 = vpop.permute.xlu0 %1569  ;;  %v1551_v40 = vpop.permute.xlu1 %1550 }
0x1557   :  { %v1572_v42 = vsel %vm292_vm6, %v1570_v55, %v1567_v22  ;;  %1701 = vst.msk [vmem:[%s2510_s5 + $0x1c] sm:$0x7] %vm272_vm1, %v1551_v40 }
0x1558   :  { %1574 = vst.msk [vmem:[#allocation5] sm:$0x7] %vm78_vm0, %v1572_v42 }
0x1559   :  { %1887 = shalt.err (!%p1884_p9)
}
0x155a   :  { %1596 = dma.vmem_to_hbm [thread:$0]  %s1594_s2, 64, %s2512_s7, [#allocation4]  }
0x1578   :  { %v1563_v45 = vpop.permute.xlu0 %1562 }
0x1579   :  { %1565 = vst.msk [vmem:[%s2511_s6] sm:$0x7] %vm272_vm1, %v1563_v45 }
0x157a   :  { %1898 = dma.done.wait [#allocation4], 64  }
0x157b   :  { %1899 = vsyncadd [#allocation4], 4294967232 }
0x157c   :  { %1610 = vsyncpa [#allocation3], 1 }
0x157d   :  { %1611 = vsyncpa [#allocation4], 1 }

</bundles_post_ra>
